<compile_context>
chip_gen: v7x
topology: tpu7x:2x2x1
jax: 0.10.0
libtpu: 0.0.40
codegen_flags: <defaults>
</compile_context>

<pallas_src>
import functools

import jax
import jax.numpy as jnp
from jax.experimental import pallas as pl
from jax.experimental.pallas import tpu as pltpu


def _vq_kernel(x_ref, cbt_ref, cb_ref, cn_ref, z_ref, q_ref, err_ref, *, m_total):
    tm, _ = x_ref.shape
    k = cbt_ref.shape[1]

    # Row-validity mask for the (possibly ragged) last tile.
    row = pl.program_id(0) * tm + jax.lax.broadcasted_iota(jnp.int32, (tm, 1), 0)
    valid = row < m_total
    x = jnp.where(valid, x_ref[...].astype(jnp.float32), 0.0)

    # Squared-distance proxy: ||c_j||^2 - 2 x.c_j  (||x||^2 is row-constant and
    # cannot change the argmin, so it is dropped).
    scores = jnp.dot(x, cbt_ref[...], preferred_element_type=jnp.float32)   # (tm, k)
    dist = cn_ref[...] - 2.0 * scores

    # First-occurrence argmin (matches torch.min tie-breaking), implemented with
    # float lane reductions only (no integer cross-lane reduce, no jnp.argmin).
    min_d = jnp.min(dist, axis=-1, keepdims=True)
    colf = jax.lax.broadcasted_iota(jnp.int32, (tm, k), 1).astype(jnp.float32)
    zf = jnp.min(jnp.where(dist <= min_d, colf, float(k)), axis=-1, keepdims=True)

    # Codebook gather as a one-hot MXU matmul.
    one_hot = (colf == zf).astype(jnp.float32)
    q = jnp.dot(one_hot, cb_ref[...], preferred_element_type=jnp.float32)   # (tm, d)

    diff = q - x
    err = jnp.sum(diff * diff, axis=-1, keepdims=True)                      # (tm, 1)

    z_ref[...] = zf.astype(jnp.int32)
    q_ref[...] = q.astype(q_ref.dtype)
    err_ref[...] = jnp.where(valid, err, 0.0)


def vqvae_forward(x, codebook, *, tile_m=256):
    """Forward of the VQVAE module: returns (Z, q_with_st, (vq_loss, commitment_loss))."""
    M, D = x.shape
    K, D2 = codebook.shape
    assert D == D2

    cb = codebook.astype(jnp.float32)          # (K, D)   for the one-hot gather matmul
    cbt = cb.T                                 # (D, K)   for the score matmul
    cnorm = jnp.sum(cb * cb, axis=1).reshape(1, K)

    tm = M if M <= tile_m else tile_m          # block == full array if M is small
    grid = (pl.cdiv(M, tm),)

    z, q, err = pl.pallas_call(
        functools.partial(_vq_kernel, m_total=M),
        out_shape=(
            jax.ShapeDtypeStruct((M, 1), jnp.int32),
            jax.ShapeDtypeStruct((M, D), jnp.float32),
            jax.ShapeDtypeStruct((M, 1), jnp.float32),
        ),
        grid=grid,
        in_specs=[
            pl.BlockSpec((tm, D), lambda i: (i, 0)),
            pl.BlockSpec((D, K), lambda i: (0, 0)),
            pl.BlockSpec((K, D), lambda i: (0, 0)),
            pl.BlockSpec((1, K), lambda i: (0, 0)),
        ],
        out_specs=(
            pl.BlockSpec((tm, 1), lambda i: (i, 0)),
            pl.BlockSpec((tm, D), lambda i: (i, 0)),
            pl.BlockSpec((tm, 1), lambda i: (i, 0)),
        ),
        compiler_params=pltpu.CompilerParams(dimension_semantics=("parallel",)),
    )(x.astype(jnp.float32), cbt, cb, cnorm)

    Z = z[:, 0]
    x32 = x.astype(jnp.float32)
    # Same arithmetic (and rounding) as PyTorch's x + (q - x).detach().
    q_with_st = x32 + jax.lax.stop_gradient(q - x32)
    loss = jnp.sum(err) / (M * D)
    # TODO(synk): the .detach() asymmetry between vq_loss and commitment_loss only
    # affects gradients; their forward values are identical, so one fused scalar is
    # returned for both (straight-through gradient semantics are autograd-only).
    return Z, q_with_st, (loss, loss)


if __name__ == "__main__":
    key = jax.random.PRNGKey(0)
    kx, kc = jax.random.split(key)

    num_latents, embedding_dim = 128, 32
    M = 500  # deliberately NOT a multiple of the 256-row tile (exercises the ragged tail)

    x = jax.random.normal(kx, (M, embedding_dim), jnp.float32)
    # Matches nn.Parameter(torch.rand(K, D) * 0.2 - 0.1): uniform(-0.1, 0.1).
    codebook = jax.random.uniform(kc, (num_latents, embedding_dim), jnp.float32,
                                  minval=-0.1, maxval=0.1)

    fwd = jax.jit(vqvae_forward)
    Z, q_st, (vq_loss, commitment_loss) = jax.block_until_ready(fwd(x, codebook))

    # ---- pure-JAX reference checks ----
    assert Z.shape == (M,) and Z.dtype == jnp.int32
    assert q_st.shape == (M, embedding_dim)

    dist_ref = (jnp.sum(codebook ** 2, axis=1)[None, :]
                - 2.0 * x @ codebook.T
                + jnp.sum(x ** 2, axis=1, keepdims=True))
    min_ref = jnp.min(dist_ref, axis=-1)
    picked = dist_ref[jnp.arange(M), Z]
    assert bool(jnp.all(picked <= min_ref + 1e-3))                  # picked a nearest code
    assert bool(jnp.allclose(q_st, codebook[Z], atol=1e-5))         # forward of straight-through == codebook[Z]
    ref_loss = jnp.mean((codebook[Z] - x) ** 2)
    assert bool(jnp.allclose(vq_loss, ref_loss, rtol=1e-5, atol=1e-6))
    assert bool(jnp.allclose(commitment_loss, ref_loss, rtol=1e-5, atol=1e-6))
    assert bool(jnp.all(jnp.isfinite(q_st)))

    print("KERNEL_OK")
</pallas_src>

<mosaic_0001>
module attributes {stable_mosaic.version = 11 : i64} {
  func.func @_vq_kernel(%arg0: i32, %arg1: memref<256x32xf32, #tpu.memory_space<vmem>>, %arg2: memref<32x128xf32, #tpu.memory_space<vmem>>, %arg3: memref<128x32xf32, #tpu.memory_space<vmem>>, %arg4: memref<1x128xf32, #tpu.memory_space<vmem>>, %arg5: memref<256x1xi32, #tpu.memory_space<vmem>>, %arg6: memref<256x32xf32, #tpu.memory_space<vmem>>, %arg7: memref<256x1xf32, #tpu.memory_space<vmem>>) attributes {dimension_semantics = [#tpu.dimension_semantics<parallel>], iteration_bounds = array<i64: 2>, scalar_prefetch = 0 : i64, scratch_operands = 0 : i64, tpu.core_type = #tpu.core_type<tc>, window_params = [{transform_indices = @transform_0, window_bounds = array<i64: 256, 32>}, {pipeline_mode = #tpu.pipeline_mode<synchronous>, transform_indices = @transform_1, window_bounds = array<i64: 32, 128>}, {pipeline_mode = #tpu.pipeline_mode<synchronous>, transform_indices = @transform_2, window_bounds = array<i64: 128, 32>}, {pipeline_mode = #tpu.pipeline_mode<synchronous>, transform_indices = @transform_3, window_bounds = array<i64: 1, 128>}, {transform_indices = @transform_4, window_bounds = array<i64: 256, 1>}, {transform_indices = @transform_5, window_bounds = array<i64: 256, 32>}, {transform_indices = @transform_6, window_bounds = array<i64: 256, 1>}]} {
    %c256_i32 = arith.constant 256 : i32
    %0 = arith.muli %arg0, %c256_i32 : i32
    %1 = tpu.iota {dimensions = array<i32: 0>} : vector<256x1xi32>
    %2 = vector.broadcast %0 : i32 to vector<256x1xi32>
    %3 = arith.addi %2, %1 : vector<256x1xi32>
    %c500_i32 = arith.constant 500 : i32
    %4 = vector.broadcast %c500_i32 : i32 to vector<256x1xi32>
    %5 = arith.cmpi slt, %3, %4 : vector<256x1xi32>
    %c0 = arith.constant 0 : index
    %c0_0 = arith.constant 0 : index
    %6 = vector.load %arg1[%c0, %c0_0] : memref<256x32xf32, #tpu.memory_space<vmem>>, vector<256x32xf32>
    %cst = arith.constant 0.000000e+00 : f32
    %7 = vector.shape_cast %5 : vector<256x1xi1> to vector<256x1xi1>
    %8 = vector.broadcast %7 : vector<256x1xi1> to vector<256x32xi1>
    %9 = vector.broadcast %cst : f32 to vector<256x32xf32>
    %10 = arith.select %8, %6, %9 : vector<256x32xi1>, vector<256x32xf32>
    %c0_1 = arith.constant 0 : index
    %c0_2 = arith.constant 0 : index
    %11 = vector.load %arg2[%c0_1, %c0_2] : memref<32x128xf32, #tpu.memory_space<vmem>>, vector<32x128xf32>
    %cst_3 = arith.constant dense<0.000000e+00> : vector<256x128xf32>
    %12 = tpu.matmul %10, %11, %cst_3 {dimension_numbers = #tpu.dot_dimension_numbers<[1], [0], [0], [1], [0, 0, 1, 1], [], []>} : vector<256x32xf32>, vector<32x128xf32>, vector<256x128xf32> -> vector<256x128xf32>
    %c0_4 = arith.constant 0 : index
    %c0_5 = arith.constant 0 : index
    %13 = vector.load %arg4[%c0_4, %c0_5] : memref<1x128xf32, #tpu.memory_space<vmem>>, vector<1x128xf32>
    %cst_6 = arith.constant 2.000000e+00 : f32
    %14 = vector.broadcast %cst_6 : f32 to vector<256x128xf32>
    %15 = arith.mulf %14, %12 : vector<256x128xf32>
    %16 = vector.broadcast %13 : vector<1x128xf32> to vector<256x128xf32>
    %17 = arith.subf %16, %15 : vector<256x128xf32>
    %cst_7 = arith.constant dense<0x7F800000> : vector<256xf32>
    %18 = vector.multi_reduction <minimumf>, %17, %cst_7 [1] : vector<256x128xf32> to vector<256xf32>
    %19 = vector.shape_cast %18 : vector<256xf32> to vector<256x1xf32>
    %20 = tpu.iota {dimensions = array<i32: 1>} : vector<256x128xi32>
    %21 = arith.sitofp %20 : vector<256x128xi32> to vector<256x128xf32>
    %22 = vector.broadcast %19 : vector<256x1xf32> to vector<256x128xf32>
    %23 = arith.cmpf ole, %17, %22 : vector<256x128xf32>
    %cst_8 = arith.constant 1.280000e+02 : f32
    %24 = vector.broadcast %cst_8 : f32 to vector<256x128xf32>
    %25 = arith.select %23, %21, %24 : vector<256x128xi1>, vector<256x128xf32>
    %cst_9 = arith.constant dense<0x7F800000> : vector<256xf32>
    %26 = vector.multi_reduction <minimumf>, %25, %cst_9 [1] : vector<256x128xf32> to vector<256xf32>
    %27 = vector.shape_cast %26 : vector<256xf32> to vector<256x1xf32>
    %28 = vector.broadcast %27 : vector<256x1xf32> to vector<256x128xf32>
    %29 = arith.cmpf oeq, %21, %28 : vector<256x128xf32>
    %30 = arith.extui %29 : vector<256x128xi1> to vector<256x128xi32>
    %31 = arith.sitofp %30 : vector<256x128xi32> to vector<256x128xf32>
    %c0_10 = arith.constant 0 : index
    %c0_11 = arith.constant 0 : index
    %32 = vector.load %arg3[%c0_10, %c0_11] : memref<128x32xf32, #tpu.memory_space<vmem>>, vector<128x32xf32>
    %cst_12 = arith.constant dense<0.000000e+00> : vector<256x32xf32>
    %33 = tpu.matmul %31, %32, %cst_12 {dimension_numbers = #tpu.dot_dimension_numbers<[1], [0], [0], [1], [0, 0, 1, 1], [], []>} : vector<256x128xf32>, vector<128x32xf32>, vector<256x32xf32> -> vector<256x32xf32>
    %34 = arith.subf %33, %10 : vector<256x32xf32>
    %35 = arith.mulf %34, %34 : vector<256x32xf32>
    %cst_13 = arith.constant dense<0.000000e+00> : vector<256xf32>
    %36 = vector.multi_reduction <add>, %35, %cst_13 [1] : vector<256x32xf32> to vector<256xf32>
    %37 = vector.shape_cast %36 : vector<256xf32> to vector<256x1xf32>
    %38 = arith.fptosi %27 : vector<256x1xf32> to vector<256x1xi32>
    %c0_14 = arith.constant 0 : index
    %c0_15 = arith.constant 0 : index
    %39 = vector.load %arg5[%c0_14, %c0_15] : memref<256x1xi32, #tpu.memory_space<vmem>>, vector<256x1xi32>
    tpu.vector_store %arg5[%c0_14, %c0_15], %38 {strides = array<i32>} : memref<256x1xi32, #tpu.memory_space<vmem>>, vector<256x1xi32>,
    %c0_16 = arith.constant 0 : index
    %c0_17 = arith.constant 0 : index
    %40 = vector.load %arg6[%c0_16, %c0_17] : memref<256x32xf32, #tpu.memory_space<vmem>>, vector<256x32xf32>
    tpu.vector_store %arg6[%c0_16, %c0_17], %33 {strides = array<i32>} : memref<256x32xf32, #tpu.memory_space<vmem>>, vector<256x32xf32>,
    %cst_18 = arith.constant 0.000000e+00 : f32
    %41 = vector.broadcast %cst_18 : f32 to vector<256x1xf32>
    %42 = arith.select %5, %37, %41 : vector<256x1xi1>, vector<256x1xf32>
    %c0_19 = arith.constant 0 : index
    %c0_20 = arith.constant 0 : index
    %43 = vector.load %arg7[%c0_19, %c0_20] : memref<256x1xf32, #tpu.memory_space<vmem>>, vector<256x1xf32>
    tpu.vector_store %arg7[%c0_19, %c0_20], %42 {strides = array<i32>} : memref<256x1xf32, #tpu.memory_space<vmem>>, vector<256x1xf32>,
    return
  }
  func.func @transform_0(%arg0: i32) -> (i32, i32) {
    %c0_i32 = arith.constant 0 : i32
    %c0_i32_0 = arith.constant 0 : i32
    return %arg0, %c0_i32 : i32, i32
  }
  func.func @transform_1(%arg0: i32) -> (i32, i32) {
    %c0_i32 = arith.constant 0 : i32
    %c0_i32_0 = arith.constant 0 : i32
    %c0_i32_1 = arith.constant 0 : i32
    return %c0_i32, %c0_i32_0 : i32, i32
  }
  func.func @transform_2(%arg0: i32) -> (i32, i32) {
    %c0_i32 = arith.constant 0 : i32
    %c0_i32_0 = arith.constant 0 : i32
    %c0_i32_1 = arith.constant 0 : i32
    return %c0_i32, %c0_i32_0 : i32, i32
  }
  func.func @transform_3(%arg0: i32) -> (i32, i32) {
    %c0_i32 = arith.constant 0 : i32
    %c0_i32_0 = arith.constant 0 : i32
    %c0_i32_1 = arith.constant 0 : i32
    return %c0_i32, %c0_i32_0 : i32, i32
  }
  func.func @transform_4(%arg0: i32) -> (i32, i32) {
    %c0_i32 = arith.constant 0 : i32
    %c0_i32_0 = arith.constant 0 : i32
    return %arg0, %c0_i32 : i32, i32
  }
  func.func @transform_5(%arg0: i32) -> (i32, i32) {
    %c0_i32 = arith.constant 0 : i32
    %c0_i32_0 = arith.constant 0 : i32
    return %arg0, %c0_i32 : i32, i32
  }
  func.func @transform_6(%arg0: i32) -> (i32, i32) {
    %c0_i32 = arith.constant 0 : i32
    %c0_i32_0 = arith.constant 0 : i32
    return %arg0, %c0_i32 : i32, i32
  }
}

</mosaic_0001>

<bundles_post_ra>
// kernel: vqvae_forward.1
= control target key start
LH: loop header
LB: loop body
LE: loop exit
PB: predicated region body
PF: predicated region fallthrough
CT: control target
= control target key end

     0   :  { %s3716_s21 = smov 0   ;;  %s3718_s22 = smov 0   ;;  %s5309_s0 = inlined_call_operand.vmem [shape: f32[500,32], index: 0, kind: input, shape index: {}]   ;;  %s5310_s1 = inlined_call_operand.vmem [shape: f32[32,128], index: 1, kind: input, shape index: {}]   ;;  %s5311_s2 = inlined_call_operand.vmem [shape: f32[128,32], index: 2, kind: input, shape index: {}]   ;;  %s5312_s3 = inlined_call_operand.vmem [shape: f32[1,128], index: 3, kind: input, shape index: {}]   ;;  %s5313_s4 = inlined_call_operand.vmem [shape: s32[500,1], index: 4, kind: output, shape index: {0}]   ;;  %s5314_s5 = inlined_call_operand.vmem [shape: f32[500,32], index: 5, kind: output, shape index: {1}]   ;;  %s5315_s6 = inlined_call_operand.vmem [shape: f32[500,1], index: 6, kind: output, shape index: {2}]  }
   0x1   :  { %s3720_s23 = smov 0  }
   0x2 LB: > { %s2743_s24 = sadd.s32 4294967295, %s3582_s23   ;;  %s3729_s25 = sadd.s32 1, %s3582_s23   ;;  %s3582_s23 = sphi %s3720_s23, %s5512_s23   ;;  %s3578_s22 = sphi %s3718_s22, %s5511_s22   ;;  %s3574_s21 = sphi %s3716_s21, %s5510_s21  }
   0x3   : > { %s110_s26 = ssub.s32 %s3582_s23, %s3729_s25  ;;  %s113_s27 = sadd.s32 1, %s3578_s22 }
   0x4   : > { %p111_p0 = scmp.eq.s32.totalorder %s110_s26, 0  ;;  %p123_p1 = scmp.ne.s32.totalorder %s3578_s22, %s3574_s21 }
   0x5   : > { %p124_p2 = scmp.eq.s32.totalorder %s2743_s24, 1  ;;  %p2747_p3 = scmp.ge.s32.totalorder %s3582_s23, 1 }
   0x6   : > { %s3736_s28 = scalar_select %p111_p0, %s3578_s22, %s113_s27  }
   0x7   : > { %p3738_p4 = por %p124_p2, %p123_p1  ;;  %p226_p5 = scmp.lt.s32.totalorder %s3582_s23, 3 }
   0x9   : > { %p227_p6 = pnand %p2747_p3, %p226_p5 }
   0xb   : > { %230 = sbr.rel (%p227_p6) target bundleno = 1208 (0x4b8), region = 36 }
  0x12   : > { %v523_v0 = vld [vmem:[%s5310_s1] sm:$0xff]  ;;  %v524_v1 = vld [vmem:[%s5310_s1 + $0x8] sm:$0xff]  ;;  %v525_v2 = vld [vmem:[%s5310_s1 + $0x10] sm:$0xff]  ;;  %s3751_s12 = sshll.u32 %s2743_s24, 5  ;;  %s3753_s13 = sshll.u32 %s2743_s24, 8  ;;  %v5329_v3 = vlaneseq  ;;  %vm527_vm0 = vcmask 261120  }
  0x13   : > { %v3127_v4 = vpack.c.bf16 %v524_v1, %v523_v0  ;;  %v526_v5 = vld [vmem:[%s5310_s1 + $0x18] sm:$0xff]  ;;  %p272_p7 = scmp.lt.s32.totalorder %s3751_s12, 62  ;;  %v3760_v6 = vstv %s3753_s13  ;;  %s252_s23 = sand.u32 1, %s3574_s21  }
  0x14   : > { %v3131_v7 = vpack.c.bf16 %v526_v5, %v525_v2  ;;  %v3763_v8 = vshrl.u32 %v5329_v3, 7  ;;  %s4413_s24 = sshll.u32 %s252_s23, 8  ;;  %s1789_s30 = ssub.s32 (%p3738_p4), 63, %s3751_s12 }
  0x15   : > { %3128 = vmatprep.subr.bf16.mxu0 %v3127_v4  ;;  %s273_s16 = scalar_select %p272_p7, %s3751_s12, 62 }
  0x16   : > { %3130 = vmatpush3.bf16.msra.mxu0 %v3127_v4  ;;  %v3768_v9 = vadd.s32 %v3760_v6, %v3763_v8  ;;  %v299_v10 = vadd.s32 8, %v3763_v8  ;;  %v300_v11 = vadd.s32 16, %v3763_v8  ;;  %v301_v12 = vadd.s32 24, %v3763_v8  ;;  %s4416_s26 = scalar_lea.vmem [#allocation2], %s4413_s24   ;;  %s4548_s21 = scalar_lea.vmem [#allocation3], %s4413_s24  }
  0x17   : > { %3132 = vmatprep.subr.bf16.mxu0 %v3131_v7  ;;  %s2752_s17 = sshll.u32 %s273_s16, 3  ;;  %v302_v13 = vadd.s32 32, %v3763_v8  ;;  %v303_v14 = vadd.s32 40, %v3763_v8  ;;  %v304_v17 = vadd.s32 48, %v3763_v8  ;;  %v305_v24 = vadd.s32 56, %v3763_v8  ;;  %s4784_s27 = scalar_lea.vmem [#allocation4], %s4413_s24  }
  0x18   : > { %5384 = vst [vmem:[#allocation5_spill] sm:$0xff] %v3768_v9  ;;  %s3778_s20 = scalar_lea.vmem %s5309_s0, %s2752_s17  ;;  %vm363_vm1 = vcmp.lt.s32.totalorder %v3768_v9, 500  ;;  %v3782_v15 = vadd.s32 %v3760_v6, %v299_v10  ;;  %v3785_v16 = vadd.s32 %v3760_v6, %v300_v11  ;;  %v3792_v21 = vadd.s32 %v3760_v6, %v301_v12  ;;  %s4919_s9 = scalar_lea.vmem (%p3738_p4), %s5313_s4, %s3753_s13  }
  0x19   : > { %v395_v18 = vld [vmem:[%s3778_s20] sm:$0xff]  ;;  %v396_v19 = vld [vmem:[%s3778_s20 + $0x8] sm:$0xff]  ;;  %v397_v20 = vld [vmem:[%s3778_s20 + $0x10] sm:$0xff]  ;;  %v3795_v22 = vadd.s32 %v3760_v6, %v302_v13  ;;  %v3817_v28 = vadd.s32 %v3760_v6, %v303_v14  ;;  %v3822_v30 = vadd.s32 %v3760_v6, %v304_v17  ;;  %v306_v31 = vadd.s32 64, %v3763_v8  ;;  %p1790_p8 = scmp.lt.s32.totalorder (%p3738_p4), %s1789_s30, 32 }
  0x1a   : > { %5385 = vst [vmem:[#allocation6_spill] sm:$0xff] %v3782_v15  ;;  %5386 = vst [vmem:[#allocation7_spill] sm:$0xff] %v3785_v16  ;;  %3134 = vmatpush3.bf16.msra.mxu0 %v3131_v7  ;;  %v3799_v23 = vsel %vm363_vm1, %v395_v18, 0.0  ;;  %vm364_vm2 = vcmp.lt.s32.totalorder %v3782_v15, 500  ;;  %vm365_vm3 = vcmp.lt.s32.totalorder %v3785_v16, 500  ;;  %vm366_vm4 = vcmp.lt.s32.totalorder %v3792_v21, 500 }
  0x1b   : > { %5387 = vst [vmem:[#allocation8_spill] sm:$0xff] %v3792_v21  ;;  %5388 = vst [vmem:[#allocation9_spill] sm:$0xff] %v3795_v22  ;;  %2999 = vmatprep.mubr.msk.f32.mxu0 %vm527_vm0, %v3799_v23  ;;  %v3808_v25 = vsel %vm364_vm2, %v396_v19, 0.0  ;;  %v3812_v26 = vsel %vm365_vm3, %v397_v20, 0.0  ;;  %v398_v27 = vld [vmem:[%s3778_s20 + $0x18] sm:$0xff]  ;;  %vm367_vm5 = vcmp.lt.s32.totalorder %v3795_v22, 500  ;;  %v3840_v35 = vadd.s32 %v3760_v6, %v305_v24 }
  0x1c   : > { %5389 = vst [vmem:[#allocation10_spill] sm:$0xff] %v3817_v28  ;;  %v399_v29 = vld [vmem:[%s3778_s20 + $0x20] sm:$0xff]  ;;  %5390 = vst [vmem:[#allocation11_spill] sm:$0xff] %v3822_v30  ;;  %v3831_v32 = vsel %vm366_vm4, %v398_v27, 0.0  ;;  %vm368_vm6 = vcmp.lt.s32.totalorder %v3817_v28, 500  ;;  %v400_v34 = vld [vmem:[%s3778_s20 + $0x28] sm:$0xff]  ;;  %v3846_v38 = vadd.s32 %v3760_v6, %v306_v31 }
  0x1d   : > { %3000 = vmatmul.mubr.msk.f32.vlgmr.msra.gmra.mrb[0].mxu0 %vm527_vm0, %v3808_v25  ;;  %v3835_v33 = vsel %vm367_vm5, %v399_v29, 0.0  ;;  %5391 = vst [vmem:[#allocation12_spill] sm:$0xff] %v3840_v35  ;;  %v307_v36 = vadd.s32 72, %v3763_v8  ;;  %vm369_vm7 = vcmp.lt.s32.totalorder %v3822_v30, 500  ;;  %v401_v37 = vld [vmem:[%s3778_s20 + $0x30] sm:$0xff]  ;;  %v308_v39 = vadd.s32 80, %v3763_v8 }
  0x1e   : > { %3002 = vmatprep.mubr.msk.f32.mxu0 %vm527_vm0, %v3812_v26  ;;  %5392 = vst [vmem:[#allocation13_spill] sm:$0xff] %v3846_v38  ;;  %v3855_v40 = vsel %vm368_vm6, %v400_v34, 0.0  ;;  %v3859_v41 = vsel %vm369_vm7, %v401_v37, 0.0  ;;  %vm370_vm8 = vcmp.lt.s32.totalorder %v3840_v35, 500  ;;  %v402_v42 = vld [vmem:[%s3778_s20 + $0x38] sm:$0xff]  ;;  %v309_v44 = vadd.s32 88, %v3763_v8 }
  0x1f   : > { %v3864_v43 = vadd.s32 %v3760_v6, %v307_v36  ;;  %vm371_vm9 = vcmp.lt.s32.totalorder %v3846_v38, 500  ;;  %v403_v45 = vld [vmem:[%s3778_s20 + $0x40] sm:$0xff]  ;;  %v3870_v46 = vadd.s32 %v3760_v6, %v308_v39  ;;  %v310_v47 = vadd.s32 96, %v3763_v8  ;;  %v404_v50 = vld [vmem:[%s3778_s20 + $0x48] sm:$0xff]  ;;  %v405_v53 = vld [vmem:[%s3778_s20 + $0x50] sm:$0xff] }
  0x20   : > { %v3879_v48 = vsel %vm370_vm8, %v402_v42, 0.0  ;;  %v3883_v49 = vsel %vm371_vm9, %v403_v45, 0.0  ;;  %v3888_v51 = vadd.s32 %v3760_v6, %v309_v44  ;;  %v311_v52 = vadd.s32 104, %v3763_v8  ;;  %v406_v58 = vld [vmem:[%s3778_s20 + $0x58] sm:$0xff]  ;;  %v407_v61 = vld [vmem:[%s3778_s20 + $0x60] sm:$0xff]  ;;  %v408_v2 = vld [vmem:[%s3778_s20 + $0x68] sm:$0xff] }
  0x21   : > { %3003 = vmatmul.mubr.msk.f32.gmra.mrb[2].mxu0 %vm527_vm0, %v3831_v32  ;;  %5393 = vst [vmem:[#allocation14_spill] sm:$0xff] %v3864_v43  ;;  %5394 = vst [vmem:[#allocation15_spill] sm:$0xff] %v3870_v46  ;;  %vm372_vm10 = vcmp.lt.s32.totalorder %v3864_v43, 500  ;;  %vm5317_vm11 = vcmp.lt.s32.totalorder %v3870_v46, 500  ;;  %v3894_v54 = vadd.s32 %v3760_v6, %v310_v47  ;;  %v312_v55 = vadd.s32 112, %v3763_v8  ;;  %v409_v7 = vld [vmem:[%s3778_s20 + $0x70] sm:$0xff] }
  0x22   : > { %3005 = vmatprep.mubr.msk.f32.mxu0 %vm527_vm0, %v3835_v33  ;;  %5395 = vst [vmem:[#allocation16_spill] sm:$0xff] %v3888_v51  ;;  %v3903_v56 = vsel %vm372_vm10, %v404_v50, 0.0  ;;  %v3907_v57 = vsel %vm5317_vm11, %v405_v53, 0.0  ;;  %vm5382_vm12 = vcmp.lt.s32.totalorder %v3888_v51, 500  ;;  %v3912_v59 = vadd.s32 %v3760_v6, %v311_v52  ;;  %v410_v14 = vld [vmem:[%s3778_s20 + $0x78] sm:$0xff]  ;;  %v411_v19 = vld [vmem:[%s3778_s20 + $0x80] sm:$0xff] }
  0x23   : > { %5396 = vst [vmem:[#allocation17_spill] sm:$0xff] %v3894_v54  ;;  %v313_v60 = vadd.s32 120, %v3763_v8  ;;  %vm5316_vm13 = vcmp.lt.s32.totalorder %v3894_v54, 500  ;;  %v3918_v62 = vadd.s32 %v3760_v6, %v312_v55  ;;  %v314_v63 = vadd.s32 128, %v3763_v8  ;;  %v412_v31 = vld [vmem:[%s3778_s20 + $0x88] sm:$0xff]  ;;  %v413_v37 = vld [vmem:[%s3778_s20 + $0x90] sm:$0xff] }
  0x24   : > { %5397 = vst [vmem:[#allocation18_spill] sm:$0xff] %v3912_v59  ;;  %v3927_v0 = vsel %vm5382_vm12, %v406_v58, 0.0  ;;  %v3931_v1 = vsel %vm5316_vm13, %v407_v61, 0.0  ;;  %vm5319_vm14 = vcmp.lt.s32.totalorder %v3912_v59, 500  ;;  %v315_v5 = vadd.s32 136, %v3763_v8  ;;  %v414_v47 = vld [vmem:[%s3778_s20 + $0x98] sm:$0xff] }
  0x25   : > { %3006 = vmatmul.mubr.msk.f32.gmra.mrb[4].mxu0 %vm527_vm0, %v3855_v40  ;;  %5398 = vst [vmem:[#allocation19_spill] sm:$0xff] %v3918_v62  ;;  %v3936_v4 = vadd.s32 %v3760_v6, %v313_v60  ;;  %vm5318_vm15 = vcmp.lt.s32.totalorder %v3918_v62, 500  ;;  %v3942_v10 = vadd.s32 %v3760_v6, %v314_v63  ;;  %v316_v11 = vadd.s32 144, %v3763_v8  ;;  %v415_v53 = vld [vmem:[%s3778_s20 + $0xa0] sm:$0xff]  ;;  %v416_v63 = vld [vmem:[%s3778_s20 + $0xa8] sm:$0xff] }
  0x26   : > { %3008 = vmatprep.mubr.msk.f32.mxu0 %vm527_vm0, %v3859_v41  ;;  %v3951_v12 = vsel %vm5319_vm14, %v408_v2, 0.0  ;;  %v3955_v13 = vsel %vm5318_vm15, %v409_v7, 0.0  ;;  %v3960_v17 = vadd.s32 %v3760_v6, %v315_v5  ;;  %v317_v18 = vadd.s32 152, %v3763_v8  ;;  %v417_v7 = vld [vmem:[%s3778_s20 + $0xb0] sm:$0xff] }
  0x27   : > { %5399 = vst [vmem:[#allocation20_spill] sm:$0xff] %v3936_v4  ;;  %5400 = vst [vmem:[#allocation21_spill] sm:$0xff] %v3942_v10  ;;  %vm5321_vm13 = vcmp.lt.s32.totalorder %v3936_v4, 500  ;;  %vm5320_vm11 = vcmp.lt.s32.totalorder %v3942_v10, 500  ;;  %v3966_v20 = vadd.s32 %v3760_v6, %v316_v11  ;;  %v318_v24 = vadd.s32 160, %v3763_v8 }
  0x28   : > { %5401 = vst [vmem:[#allocation22_spill] sm:$0xff] %v3960_v17  ;;  %v3975_v27 = vsel %vm5321_vm13, %v410_v14, 0.0  ;;  %v3979_v29 = vsel %vm5320_vm11, %v411_v19, 0.0  ;;  %vm5323_vm15 = vcmp.lt.s32.totalorder %v3960_v17, 500  ;;  %v3984_v34 = vadd.s32 %v3760_v6, %v317_v18 }
  0x29   : > { %3009 = vmatmul.mubr.msk.f32.gmra.mrb[6].mxu0 %vm527_vm0, %v3879_v48  ;;  %5402 = vst [vmem:[#allocation23_spill] sm:$0xff] %v3966_v20  ;;  %v319_v36 = vadd.s32 168, %v3763_v8  ;;  %vm5322_vm14 = vcmp.lt.s32.totalorder %v3966_v20, 500  ;;  %v3990_v39 = vadd.s32 %v3760_v6, %v318_v24  ;;  %v320_v42 = vadd.s32 176, %v3763_v8  ;;  %v418_v24 = vld [vmem:[%s3778_s20 + $0xb8] sm:$0xff] }
  0x2a   : > { %3011 = vmatprep.mubr.msk.f32.mxu0 %vm527_vm0, %v3883_v49  ;;  %5403 = vst [vmem:[#allocation24_spill] sm:$0xff] %v3984_v34  ;;  %v3999_v44 = vsel %vm5323_vm15, %v412_v31, 0.0  ;;  %v4003_v45 = vsel %vm5322_vm14, %v413_v37, 0.0  ;;  %vm5325_vm11 = vcmp.lt.s32.totalorder %v3984_v34, 500  ;;  %v321_v52 = vadd.s32 184, %v3763_v8  ;;  %v419_v37 = vld [vmem:[%s3778_s20 + $0xc0] sm:$0xff] }
  0x2b   : > { %5404 = vst [vmem:[#allocation25_spill] sm:$0xff] %v3990_v39  ;;  %v4008_v50 = vadd.s32 %v3760_v6, %v319_v36  ;;  %vm5324_vm13 = vcmp.lt.s32.totalorder %v3990_v39, 500  ;;  %v4014_v55 = vadd.s32 %v3760_v6, %v320_v42  ;;  %v322_v58 = vadd.s32 192, %v3763_v8 }
  0x2c   : > { %v4023_v60 = vsel %vm5325_vm11, %v414_v47, 0.0  ;;  %v4027_v61 = vsel %vm5324_vm13, %v415_v53, 0.0  ;;  %v4032_v2 = vadd.s32 %v3760_v6, %v321_v52  ;;  %v323_v5 = vadd.s32 200, %v3763_v8 }
  0x2d   : > { %3012 = vmatmul.mubr.msk.f32.gmra.mrb[8].mxu0 %vm527_vm0, %v3903_v56  ;;  %5405 = vst [vmem:[#allocation26_spill] sm:$0xff] %v4008_v50  ;;  %5406 = vst [vmem:[#allocation27_spill] sm:$0xff] %v4014_v55  ;;  %vm5327_vm14 = vcmp.lt.s32.totalorder %v4008_v50, 500  ;;  %vm5326_vm15 = vcmp.lt.s32.totalorder %v4014_v55, 500  ;;  %v4038_v11 = vadd.s32 %v3760_v6, %v322_v58  ;;  %v324_v14 = vadd.s32 208, %v3763_v8  ;;  %v420_v58 = vld [vmem:[%s3778_s20 + $0xc8] sm:$0xff] }
  0x2e   : > { %3014 = vmatprep.mubr.msk.f32.mxu0 %vm527_vm0, %v3907_v57  ;;  %5407 = vst [vmem:[#allocation28_spill] sm:$0xff] %v4027_v61  ;;  %5408 = vst [vmem:[#allocation29_spill] sm:$0xff] %v4032_v2  ;;  %v4047_v18 = vsel %vm5327_vm14, %v416_v63, 0.0  ;;  %v4051_v19 = vsel %vm5326_vm15, %v417_v7, 0.0  ;;  %vm5331_vm13 = vcmp.lt.s32.totalorder %v4032_v2, 500  ;;  %v4056_v31 = vadd.s32 %v3760_v6, %v323_v5  ;;  %v421_v7 = vld [vmem:[%s3778_s20 + $0xd0] sm:$0xff] }
  0x2f   : > { %5409 = vst [vmem:[#allocation30_spill] sm:$0xff] %v4038_v11  ;;  %5410 = vst [vmem:[#allocation31_spill] sm:$0xff] %v4047_v18  ;;  %v325_v36 = vadd.s32 216, %v3763_v8  ;;  %vm5328_vm11 = vcmp.lt.s32.totalorder %v4038_v11, 500  ;;  %v4062_v42 = vadd.s32 %v3760_v6, %v324_v14  ;;  %v326_v47 = vadd.s32 224, %v3763_v8  ;;  %v423_v55 = vld [vmem:[%s3778_s20 + $0xe0] sm:$0xff] }
  0x30   : > { %5411 = vst [vmem:[#allocation32_spill] sm:$0xff] %v4051_v19  ;;  %5412 = vst [vmem:[#allocation33_spill] sm:$0xff] %v4056_v31  ;;  %v4071_v52 = vsel %vm5331_vm13, %v418_v24, 0.0  ;;  %v4075_v53 = vsel %vm5328_vm11, %v419_v37, 0.0  ;;  %vm5334_vm15 = vcmp.lt.s32.totalorder %v4056_v31, 500  ;;  %v327_v5 = vadd.s32 232, %v3763_v8 }
  0x31   : > { %3015 = vmatmul.mubr.msk.f32.gmra.mrb[10].mxu0 %vm527_vm0, %v3927_v0  ;;  %5413 = vst [vmem:[#allocation34_spill] sm:$0xff] %v4062_v42  ;;  %5414 = vst [vmem:[#allocation35_spill] sm:$0xff] %v4071_v52  ;;  %v4080_v63 = vadd.s32 %v3760_v6, %v325_v36  ;;  %vm5333_vm14 = vcmp.lt.s32.totalorder %v4062_v42, 500  ;;  %v4086_v14 = vadd.s32 %v3760_v6, %v326_v47  ;;  %v328_v24 = vadd.s32 240, %v3763_v8  ;;  %v422_v47 = vld [vmem:[%s3778_s20 + $0xd8] sm:$0xff]  ;;  %v425_v42 = vld [vmem:[%s3778_s20 + $0xf0] sm:$0xff] }
  0x32   : > { %3017 = vmatprep.mubr.msk.f32.mxu0 %vm527_vm0, %v3931_v1  ;;  %5415 = vst [vmem:[#allocation36_spill] sm:$0xff] %v4075_v53  ;;  %v4095_v36 = vsel %vm5334_vm15, %v420_v58, 0.0  ;;  %v4099_v37 = vsel %vm5333_vm14, %v421_v7, 0.0  ;;  %v4104_v3 = vadd.s32 %v3760_v6, %v327_v5  ;;  %v329_v11 = vadd.s32 248, %v3763_v8  ;;  %v424_v5 = vld [vmem:[%s3778_s20 + $0xe8] sm:$0xff] }
  0x33   : > { %5416 = vst [vmem:[#allocation37_spill] sm:$0xff] %v4080_v63  ;;  %5417 = vst [vmem:[#allocation38_spill] sm:$0xff] %v4086_v14  ;;  %vm5381_vm11 = vcmp.lt.s32.totalorder %v4080_v63, 500  ;;  %vm5336_vm13 = vcmp.lt.s32.totalorder %v4086_v14, 500  ;;  %v4110_v58 = vadd.s32 %v3760_v6, %v328_v24 }
  0x34   : > { %5418 = vst [vmem:[#allocation39_spill] sm:$0xff] %v4095_v36  ;;  %5419 = vst [vmem:[#allocation40_spill] sm:$0xff] %v4099_v37  ;;  %v4118_v7 = vsel %vm5381_vm11, %v422_v47, 0.0  ;;  %v4122_v8 = vsel %vm5336_vm13, %v423_v55, 0.0  ;;  %vm5380_vm14 = vcmp.lt.s32.totalorder %v4104_v3, 500  ;;  %v4127_v24 = vadd.s32 %v3760_v6, %v329_v11  ;;  %v426_v6 = vld [vmem:[%s3778_s20 + $0xf8] sm:$0xff] }
  0x35   : > { %3018 = vmatmul.mubr.msk.f32.gmra.mrb[12].mxu0 %vm527_vm0, %v3951_v12  ;;  %5420 = vst [vmem:[#allocation41_spill] sm:$0xff] %v4104_v3  ;;  %5421 = vst [vmem:[#allocation42_spill] sm:$0xff] %v4110_v58  ;;  %vm5376_vm15 = vcmp.lt.s32.totalorder %v4110_v58, 500  ;;  %v4137_v47 = vsel %vm5380_vm14, %v424_v5, 0.0 }
  0x36   : > { %3020 = vmatprep.mubr.msk.f32.mxu0 %vm527_vm0, %v3955_v13  ;;  %5422 = vst [vmem:[#allocation43_spill] sm:$0xff] %v4118_v7  ;;  %5423 = vst [vmem:[#allocation44_spill] sm:$0xff] %v4122_v8  ;;  %v4141_v55 = vsel %vm5376_vm15, %v425_v42, 0.0  ;;  %vm5379_vm13 = vcmp.lt.s32.totalorder %v4127_v24, 500  ;;  %v4158_v42 = vld [vmem:[%s5312_s3] ss:$0 sm:$0xff] }
  0x37   : > { %5424 = vst [vmem:[#allocation45_spill] sm:$0xff] %v4127_v24  ;;  %5425 = vst [vmem:[#allocation46_spill] sm:$0xff] %v4137_v47  ;;  %v4151_v11 = vsel %vm5379_vm13, %v426_v6, 0.0 }
  0x38   : > { %5426 = vst [vmem:[#allocation47_spill] sm:$0xff] %v4141_v55  ;;  %5427 = vst [vmem:[#allocation48_spill] sm:$0xff] %v4151_v11 }
  0x39   : > { %3021 = vmatmul.mubr.msk.f32.gmra.mrb[14].mxu0 %vm527_vm0, %v3975_v27 }
  0x3a   : > { %3023 = vmatprep.mubr.msk.f32.mxu0 %vm527_vm0, %v3979_v29 }
  0x3d   : > { %3024 = vmatmul.mubr.msk.f32.gmra.mrb[16].mxu0 %vm527_vm0, %v3999_v44 }
  0x3e   : > { %3026 = vmatprep.mubr.msk.f32.mxu0 %vm527_vm0, %v4003_v45 }
  0x41   : > { %3027 = vmatmul.mubr.msk.f32.gmra.mrb[18].mxu0 %vm527_vm0, %v4023_v60 }
  0x42   : > { %3029 = vmatprep.mubr.msk.f32.mxu0 %vm527_vm0, %v4027_v61 }
  0x45   : > { %3030 = vmatmul.mubr.msk.f32.gmra.mrb[20].mxu0 %vm527_vm0, %v4047_v18 }
  0x46   : > { %3032 = vmatprep.mubr.msk.f32.mxu0 %vm527_vm0, %v4051_v19 }
  0x49   : > { %3033 = vmatmul.mubr.msk.f32.gmra.mrb[22].mxu0 %vm527_vm0, %v4071_v52 }
  0x4a   : > { %3035 = vmatprep.mubr.msk.f32.mxu0 %vm527_vm0, %v4075_v53 }
  0x4d   : > { %3036 = vmatmul.mubr.msk.f32.gmra.mrb[24].mxu0 %vm527_vm0, %v4095_v36 }
  0x4e   : > { %3038 = vmatprep.mubr.msk.f32.mxu0 %vm527_vm0, %v4099_v37 }
  0x51   : > { %3039 = vmatmul.mubr.msk.f32.gmra.mrb[26].mxu0 %vm527_vm0, %v4118_v7 }
  0x52   : > { %3041 = vmatprep.mubr.msk.f32.mxu0 %vm527_vm0, %v4122_v8 }
  0x55   : > { %3042 = vmatmul.mubr.msk.f32.gmra.mrb[28].mxu0 %vm527_vm0, %v4137_v47 }
  0x56   : > { %3044 = vmatprep.mubr.msk.f32.mxu0 %vm527_vm0, %v4141_v55 }
  0x59   : > { %3045 = vmatmul.mubr.msk.f32.gmra.mrb[30].mxu0 %vm527_vm0, %v4151_v11 }
  0xf0   : > { %v3001_v5 = vpop.f32.mrb[0].mxu0 }
  0xf1   : > { %v690_v58 = vpop.f32.mrb[1].mxu0  ;;  %v851_v54 = vmul.f32 2.0, %v3001_v5 }
  0xf2   : > { %v850_v14 = vmul.f32 2.0, %v690_v58 }
  0xf4   : > { %v4160_v3 = vpop.f32.mrb[2].mxu0  ;;  %v4163_v63 = vsub.f32 %v4158_v42, %v850_v14 }
  0xf5   : > { %v4165_v31 = vpop.f32.mrb[3].mxu0 }
  0xf6   : > { %920 = vmin.xlane.f32.xlu0 %v4163_v63 }
  0xf8   : > { %v3007_v6 = vpop.f32.mrb[4].mxu0 }
  0xf9   : > { %v855_v24 = vmul.f32 2.0, %v3007_v6  ;;  %v4168_v2 = vpop.f32.mrb[5].mxu0 }
  0xfb   : > { %v4171_v39 = vsub.f32 %v4158_v42, %v855_v24 }
  0xfc   : > { %v3010_v50 = vpop.f32.mrb[6].mxu0 }
  0xfd   : > { %v857_v20 = vmul.f32 2.0, %v3010_v50  ;;  %v720_v34 = vpop.f32.mrb[7].mxu0 }
  0xfe   : > { %v856_v58 = vmul.f32 2.0, %v720_v34 }
  0xff   : > { %v4174_v10 = vsub.f32 %v4158_v42, %v857_v20 }
 0x100   : > { %v3013_v14 = vpop.f32.mrb[8].mxu0  ;;  %v4178_v6 = vsub.f32 %v4158_v42, %v856_v58 }
 0x101   : > { %v859_v17 = vmul.f32 2.0, %v3013_v14  ;;  %934 = vmin.xlane.f32.xlu0 %v4174_v10  ;;  %v730_v62 = vpop.f32.mrb[9].mxu0 }
 0x102   : > { %v858_v4 = vmul.f32 2.0, %v730_v62  ;;  %v4189_v62 = vsub.f32 %v4158_v42, %v851_v54 }
 0x103   : > { %v4181_v24 = vsub.f32 %v4158_v42, %v859_v17 }
 0x104   : > { %v3016_v59 = vpop.f32.mrb[10].mxu0  ;;  %v4186_v50 = vsub.f32 %v4158_v42, %v858_v4 }
 0x105   : > { %932 = vmin.xlane.f32.xlu0 %v4178_v6  ;;  %938 = vmin.xlane.f32.xlu1 %v4181_v24  ;;  %v861_v20 = vmul.f32 2.0, %v3016_v59  ;;  %v740_v34 = vpop.f32.mrb[11].mxu0 }
 0x106   : > { %v860_v14 = vmul.f32 2.0, %v740_v34 }
 0x107   : > { %v4194_v46 = vsub.f32 %v4158_v42, %v861_v20 }
 0x108   : > { %v3019_v5 = vpop.f32.mrb[12].mxu0  ;;  %v4197_v59 = vsub.f32 %v4158_v42, %v860_v14 }
 0x109   : > { %922 = vmin.xlane.f32.xlu0 %v4189_v62  ;;  %936 = vmin.xlane.f32.xlu1 %v4186_v50  ;;  %v863_v17 = vmul.f32 2.0, %v3019_v5  ;;  %v750_v58 = vpop.f32.mrb[13].mxu0 }
 0x10a   : > { %v862_v51 = vmul.f32 2.0, %v750_v58 }
 0x10b   : > { %v4202_v38 = vsub.f32 %v4158_v42, %v863_v17 }
 0x10c   : > { %v3022_v4 = vpop.f32.mrb[14].mxu0  ;;  %v4205_v5 = vsub.f32 %v4158_v42, %v862_v51 }
 0x10d   : > { %942 = vmin.xlane.f32.xlu1 %v4194_v46  ;;  %940 = vmin.xlane.f32.xlu0 %v4197_v59  ;;  %v865_v54 = vmul.f32 2.0, %v3022_v4  ;;  %v760_v34 = vpop.f32.mrb[15].mxu0 }
 0x10e   : > { %v864_v43 = vmul.f32 2.0, %v760_v34 }
 0x10f   : > { %v4210_v30 = vsub.f32 %v4158_v42, %v865_v54 }
 0x110   : > { %v3025_v20 = vpop.f32.mrb[16].mxu0  ;;  %v4213_v4 = vsub.f32 %v4158_v42, %v864_v43 }
 0x111   : > { %946 = vmin.xlane.f32.xlu1 %v4202_v38  ;;  %944 = vmin.xlane.f32.xlu0 %v4205_v5  ;;  %v867_v14 = vmul.f32 2.0, %v3025_v20  ;;  %v770_v58 = vpop.f32.mrb[17].mxu0 }
 0x112   : > { %v866_v35 = vmul.f32 2.0, %v770_v58 }
 0x113   : > { %v4218_v22 = vsub.f32 %v4158_v42, %v867_v14 }
 0x114   : > { %v3028_v17 = vpop.f32.mrb[18].mxu0  ;;  %v4221_v20 = vsub.f32 %v4158_v42, %v866_v35 }
 0x115   : > { %950 = vmin.xlane.f32.xlu1 %v4210_v30  ;;  %948 = vmin.xlane.f32.xlu0 %v4213_v4  ;;  %v869_v51 = vmul.f32 2.0, %v3028_v17  ;;  %v780_v34 = vpop.f32.mrb[19].mxu0 }
 0x116   : > { %v868_v28 = vmul.f32 2.0, %v780_v34 }
 0x117   : > { %v4226_v16 = vsub.f32 %v4158_v42, %v869_v51 }
 0x118   : > { %v3031_v54 = vpop.f32.mrb[20].mxu0  ;;  %v4229_v17 = vsub.f32 %v4158_v42, %v868_v28 }
 0x119   : > { %954 = vmin.xlane.f32.xlu1 %v4218_v22  ;;  %952 = vmin.xlane.f32.xlu0 %v4221_v20  ;;  %v871_v43 = vmul.f32 2.0, %v3031_v54  ;;  %v790_v58 = vpop.f32.mrb[21].mxu0 }
 0x11a   : > { %v870_v21 = vmul.f32 2.0, %v790_v58 }
 0x11b   : > { %v4234_v9 = vsub.f32 %v4158_v42, %v871_v43 }
 0x11c   : > { %v3034_v14 = vpop.f32.mrb[22].mxu0  ;;  %v4237_v54 = vsub.f32 %v4158_v42, %v870_v21 }
 0x11d   : > { %958 = vmin.xlane.f32.xlu1 %v4226_v16  ;;  %956 = vmin.xlane.f32.xlu0 %v4229_v17  ;;  %v873_v35 = vmul.f32 2.0, %v3034_v14  ;;  %v800_v34 = vpop.f32.mrb[23].mxu0 }
 0x11e   : > { %v872_v15 = vmul.f32 2.0, %v800_v34 }
 0x11f   : > { %v4242_v55 = vsub.f32 %v4158_v42, %v873_v35  ;;  %v852_v35 = vmul.f32 2.0, %v4165_v31 }
 0x120   : > { %v3037_v51 = vpop.f32.mrb[24].mxu0  ;;  %v4245_v14 = vsub.f32 %v4158_v42, %v872_v15 }
 0x121   : > { %962 = vmin.xlane.f32.xlu1 %v4234_v9  ;;  %960 = vmin.xlane.f32.xlu0 %v4237_v54  ;;  %v875_v28 = vmul.f32 2.0, %v3037_v51  ;;  %v810_v58 = vpop.f32.mrb[25].mxu0  ;;  %v4263_v7 = vsub.f32 %v4158_v42, %v852_v35 }
 0x122   : > { %v874_v11 = vmul.f32 2.0, %v810_v58 }
 0x123   : > { %v4250_v34 = vsub.f32 %v4158_v42, %v875_v28  ;;  %v853_v28 = vmul.f32 2.0, %v4160_v3  ;;  %v854_v3 = vmul.f32 2.0, %v4168_v2  ;;  %v1211_v2 = vld [vmem:[%s5311_s2] sm:$0xff] }
 0x124   : > { %v3040_v43 = vpop.f32.mrb[26].mxu0  ;;  %v4253_v8 = vsub.f32 %v4158_v42, %v874_v11 }
 0x125   : > { %966 = vmin.xlane.f32.xlu1 %v4242_v55  ;;  %964 = vmin.xlane.f32.xlu0 %v4245_v14  ;;  %v877_v21 = vmul.f32 2.0, %v3040_v43  ;;  %v820_v51 = vpop.f32.mrb[27].mxu0  ;;  %v4275_v35 = vsub.f32 %v4158_v42, %v853_v28 }
 0x126   : > { %v876_v15 = vmul.f32 2.0, %v820_v51 }
 0x127   : > { %v4259_v58 = vsub.f32 %v4158_v42, %v877_v21 }
 0x128   : > { %v3043_v47 = vpop.f32.mrb[28].mxu0  ;;  %v4271_v51 = vsub.f32 %v4158_v42, %v876_v15  ;;  %v1213_v15 = vld [vmem:[%s5311_s2 + $0x10] sm:$0xff] }
 0x129   : > { %970 = vmin.xlane.f32.xlu1 %v4250_v34  ;;  %968 = vmin.xlane.f32.xlu0 %v4253_v8  ;;  %v830_v37 = vpop.f32.mrb[29].mxu0  ;;  %v879_v31 = vmul.f32 2.0, %v3043_v47 }
 0x12a   : > { %v878_v43 = vmul.f32 2.0, %v830_v37 }
 0x12b   : > { %v4286_v47 = vsub.f32 %v4158_v42, %v879_v31 }
 0x12c   : > { %v3046_v11 = vpop.f32.mrb[30].mxu0  ;;  %v4266_v53 = vsub.f32 %v4158_v42, %v878_v43 }
 0x12d   : > { %924 = vmin.xlane.f32.xlu0 %v4263_v7  ;;  %974 = vmin.xlane.f32.xlu1 %v4259_v58  ;;  %v881_v21 = vmul.f32 2.0, %v3046_v11  ;;  %v840_v36 = vpop.f32.mrb[31].mxu0  ;;  %v1214_v11 = vld [vmem:[%s5311_s2 + $0x18] sm:$0xff] }
 0x12e   : > { %v880_v37 = vmul.f32 2.0, %v840_v36  ;;  %v4289_v36 = vsub.f32 %v4158_v42, %v854_v3  ;;  %v3139_v31 = vpack.c.bf16 %v1214_v11, %v1213_v15  ;;  %v1220_v11 = vld [vmem:[%s5311_s2 + $0x48] sm:$0xff] }
 0x12f   : > { %v4278_v19 = vsub.f32 %v4158_v42, %v881_v21  ;;  %v1215_v21 = vld [vmem:[%s5311_s2 + $0x20] sm:$0xff] }
 0x130   : > { %v4281_v43 = vsub.f32 %v4158_v42, %v880_v37  ;;  %v1212_v42 = vld [vmem:[%s5311_s2 + $0x8] sm:$0xff] }
 0x131   : > { %926 = vmin.xlane.f32.xlu0 %v4275_v35  ;;  %972 = vmin.xlane.f32.xlu1 %v4271_v51  ;;  %v3135_v28 = vpack.c.bf16 %v1212_v42, %v1211_v2  ;;  %v1216_v37 = vld [vmem:[%s5311_s2 + $0x28] sm:$0xff]  ;;  %v1217_v2 = vld [vmem:[%s5311_s2 + $0x30] sm:$0xff]  ;;  %v1218_v42 = vld [vmem:[%s5311_s2 + $0x38] sm:$0xff] }
 0x132   : > { %v3143_v3 = vpack.c.bf16 %v1216_v37, %v1215_v21  ;;  %v3147_v15 = vpack.c.bf16 %v1218_v42, %v1217_v2 }
 0x133   : > { %3136 = vmatprep.subr.bf16.mxu0 %v3135_v28  ;;  %3167 = vmatprep.subr.bf16.mxu1 %v3135_v28 }
 0x134   : > { %3138 = vmatpush3.bf16.msra.mxu0 %v3135_v28  ;;  %3175 = vmatpush3.bf16.msra.mxu1 %v3135_v28  ;;  %v1219_v28 = vld [vmem:[%s5311_s2 + $0x40] sm:$0xff] }
 0x135   : > { %928 = vmin.xlane.f32.xlu0 %v4289_v36  ;;  %978 = vmin.xlane.f32.xlu1 %v4286_v47  ;;  %v3151_v21 = vpack.c.bf16 %v1220_v11, %v1219_v28 }
 0x136   : > { %3140 = vmatprep.subr.bf16.mxu0 %v3139_v31  ;;  %3168 = vmatprep.subr.bf16.mxu1 %v3139_v31 }
 0x138   : > { %3142 = vmatpush3.bf16.msra.mxu0 %v3139_v31  ;;  %3176 = vmatpush3.bf16.msra.mxu1 %v3139_v31  ;;  %v5428_v31 = vlaneseq }
 0x139   : > { %930 = vmin.xlane.f32.xlu0 %v4171_v39  ;;  %976 = vmin.xlane.f32.xlu1 %v4266_v53 }
 0x13a   : > { %3144 = vmatprep.subr.bf16.mxu0 %v3143_v3  ;;  %3169 = vmatprep.subr.bf16.mxu1 %v3143_v3  ;;  %v985_v37 = vand.u32 127, %v5428_v31 }
 0x13c   : > { %3146 = vmatpush3.bf16.msra.mxu0 %v3143_v3  ;;  %3177 = vmatpush3.bf16.msra.mxu1 %v3143_v3  ;;  %v4328_v42 = vcvt.s32.f32 %v985_v37 }
 0x13d   : > { %980 = vmin.xlane.f32.xlu1 %v4281_v43  ;;  %3148 = vmatprep.subr.bf16.mxu0 %v3147_v15 }
 0x13e   : > { %3170 = vmatprep.subr.bf16.mxu1 %v3147_v15 }
 0x140   : > { %3150 = vmatpush3.bf16.msra.mxu0 %v3147_v15  ;;  %3178 = vmatpush3.bf16.msra.mxu1 %v3147_v15 }
 0x141   : > { %982 = vmin.xlane.f32.xlu1 %v4278_v19  ;;  %3152 = vmatprep.subr.bf16.mxu0 %v3151_v21 }
 0x142   : > { %3171 = vmatprep.subr.bf16.mxu1 %v3151_v21 }
 0x144   : > { %3154 = vmatpush3.bf16.msra.mxu0 %v3151_v21  ;;  %3179 = vmatpush3.bf16.msra.mxu1 %v3151_v21 }
 0x183   : > { %v921_v2 = vpop.xlane.xlu0 %920 }
 0x184   : > { %vm987_vm11 = vcmp.le.f32.partialorder %v4163_v63, %v921_v2  ;;  %v1222_v63 = vld [vmem:[%s5311_s2 + $0x58] sm:$0xff] }
 0x18e   : > { %v935_v52 = vpop.xlane.xlu0 %934 }
 0x18f   : > { %vm994_vm15 = vcmp.le.f32.partialorder %v4174_v10, %v935_v52 }
 0x190   : > { %v1026_v61 = vsel %vm994_vm15, %v4328_v42, 128.0 }
 0x191   : > { %1065 = vmin.xlane.f32.xlu1 %v1026_v61  ;;  %v1019_v61 = vsel %vm987_vm11, %v4328_v42, 128.0 }
 0x192   : > { %v933_v3 = vpop.xlane.xlu0 %932  ;;  %v939_v18 = vpop.xlane.xlu1 %938 }
 0x193   : > { %vm996_vm13 = vcmp.le.f32.partialorder %v4181_v24, %v939_v18 }
 0x194   : > { %v1028_v15 = vsel %vm996_vm13, %v4328_v42, 128.0  ;;  %vm993_vm13 = vcmp.le.f32.partialorder %v4178_v6, %v933_v3 }
 0x195   : > { %1069 = vmin.xlane.f32.xlu1 %v1028_v15  ;;  %v1025_v37 = vsel %vm993_vm13, %v4328_v42, 128.0  ;;  %v1223_v15 = vld [vmem:[%s5311_s2 + $0x60] sm:$0xff] }
 0x196   : > { %v923_v28 = vpop.xlane.xlu0 %922  ;;  %v937_v11 = vpop.xlane.xlu1 %936 }
 0x197   : > { %vm988_vm14 = vcmp.le.f32.partialorder %v4189_v62, %v923_v28  ;;  %v1221_v62 = vld [vmem:[%s5311_s2 + $0x50] sm:$0xff]  ;;  %vm995_vm11 = vcmp.le.f32.partialorder %v4186_v50, %v937_v11 }
 0x198   : > { %v1020_v21 = vsel %vm988_vm14, %v4328_v42, 128.0  ;;  %v1027_v50 = vsel %vm995_vm11, %v4328_v42, 128.0 }
 0x199   : > { %1053 = vmin.xlane.f32.xlu0 %v1020_v21 }
 0x19a   : > { %v943_v10 = vpop.xlane.xlu1 %942  ;;  %v941_v52 = vpop.xlane.xlu0 %940 }
 0x19b   : > { %vm998_vm15 = vcmp.le.f32.partialorder %v4194_v46, %v943_v10  ;;  %v3155_v46 = vpack.c.bf16 %v1222_v63, %v1221_v62  ;;  %vm997_vm13 = vcmp.le.f32.partialorder %v4197_v59, %v941_v52 }
 0x19c   : > { %v1030_v18 = vsel %vm998_vm15, %v4328_v42, 128.0  ;;  %v1029_v59 = vsel %vm997_vm13, %v4328_v42, 128.0 }
 0x19d   : > { %1051 = vmin.xlane.f32.xlu0 %v1019_v61  ;;  %1073 = vmin.xlane.f32.xlu1 %v1030_v18  ;;  %v1225_v61 = vld [vmem:[%s5311_s2 + $0x70] sm:$0xff] }
 0x19e   : > { %v947_v24 = vpop.xlane.xlu1 %946  ;;  %v945_v31 = vpop.xlane.xlu0 %944  ;;  %3156 = vmatprep.subr.bf16.mxu0 %v3155_v46  ;;  %3172 = vmatprep.subr.bf16.mxu1 %v3155_v46 }
 0x19f   : > { %vm1000_vm14 = vcmp.le.f32.partialorder %v4202_v38, %v947_v24  ;;  %v1224_v38 = vld [vmem:[%s5311_s2 + $0x68] sm:$0xff]  ;;  %3158 = vmatpush3.bf16.msra.mxu0 %v3155_v46  ;;  %3180 = vmatpush3.bf16.msra.mxu1 %v3155_v46  ;;  %vm999_vm11 = vcmp.le.f32.partialorder %v4205_v5, %v945_v31 }
 0x1a0   : > { %v1032_v2 = vsel %vm1000_vm14, %v4328_v42, 128.0  ;;  %v3159_v28 = vpack.c.bf16 %v1224_v38, %v1223_v15 }
 0x1a1   : > { %1063 = vmin.xlane.f32.xlu0 %v1025_v37  ;;  %1077 = vmin.xlane.f32.xlu1 %v1032_v2 }
 0x1a2   : > { %v951_v6 = vpop.xlane.xlu1 %950  ;;  %v949_v3 = vpop.xlane.xlu0 %948  ;;  %3160 = vmatprep.subr.bf16.mxu0 %v3159_v28  ;;  %3173 = vmatprep.subr.bf16.mxu1 %v3159_v28 }
 0x1a3   : > { %vm1002_vm15 = vcmp.le.f32.partialorder %v4210_v30, %v951_v6  ;;  %v1226_v30 = vld [vmem:[%s5311_s2 + $0x78] sm:$0xff]  ;;  %3162 = vmatpush3.bf16.msra.mxu0 %v3159_v28  ;;  %3181 = vmatpush3.bf16.msra.mxu1 %v3159_v28  ;;  %vm1001_vm13 = vcmp.le.f32.partialorder %v4213_v4, %v949_v3 }
 0x1a4   : > { %v1034_v11 = vsel %vm1002_vm15, %v4328_v42, 128.0  ;;  %v3163_v18 = vpack.c.bf16 %v1226_v30, %v1225_v61  ;;  %v1033_v31 = vsel %vm1001_vm13, %v4328_v42, 128.0 }
 0x1a5   : > { %1067 = vmin.xlane.f32.xlu0 %v1027_v50  ;;  %1081 = vmin.xlane.f32.xlu1 %v1034_v11 }
 0x1a6   : > { %v955_v21 = vpop.xlane.xlu1 %954  ;;  %v953_v10 = vpop.xlane.xlu0 %952  ;;  %3164 = vmatprep.subr.bf16.mxu0 %v3163_v18  ;;  %3174 = vmatprep.subr.bf16.mxu1 %v3163_v18 }
 0x1a7   : > { %vm1004_vm14 = vcmp.le.f32.partialorder %v4218_v22, %v955_v21  ;;  %3166 = vmatpush3.bf16.msra.mxu0 %v3163_v18  ;;  %3182 = vmatpush3.bf16.msra.mxu1 %v3163_v18  ;;  %v1031_v22 = vsel %vm999_vm11, %v4328_v42, 128.0  ;;  %vm1003_vm12 = vcmp.le.f32.partialorder %v4221_v20, %v953_v10 }
 0x1a8   : > { %v1036_v52 = vsel %vm1004_vm14, %v4328_v42, 128.0  ;;  %v1035_v4 = vsel %vm1003_vm12, %v4328_v42, 128.0 }
 0x1a9   : > { %1071 = vmin.xlane.f32.xlu0 %v1029_v59  ;;  %1085 = vmin.xlane.f32.xlu1 %v1036_v52 }
 0x1aa   : > { %v959_v24 = vpop.xlane.xlu1 %958  ;;  %v957_v62 = vpop.xlane.xlu0 %956 }
 0x1ab   : > { %vm1006_vm15 = vcmp.le.f32.partialorder %v4226_v16, %v959_v24 }
 0x1ac   : > { %v1038_v63 = vsel %vm1006_vm15, %v4328_v42, 128.0  ;;  %vm1005_vm15 = vcmp.le.f32.partialorder %v4229_v17, %v957_v62 }
 0x1ad   : > { %1075 = vmin.xlane.f32.xlu0 %v1031_v22  ;;  %1089 = vmin.xlane.f32.xlu1 %v1038_v63  ;;  %v1037_v20 = vsel %vm1005_vm15, %v4328_v42, 128.0 }
 0x1ae   : > { %v963_v46 = vpop.xlane.xlu1 %962  ;;  %v961_v5 = vpop.xlane.xlu0 %960 }
 0x1af   : > { %vm1008_vm14 = vcmp.le.f32.partialorder %v4234_v9, %v963_v46 }
 0x1b0   : > { %v1040_v37 = vsel %vm1008_vm14, %v4328_v42, 128.0  ;;  %vm1007_vm14 = vcmp.le.f32.partialorder %v4237_v54, %v961_v5 }
 0x1b1   : > { %1079 = vmin.xlane.f32.xlu0 %v1033_v31  ;;  %1093 = vmin.xlane.f32.xlu1 %v1040_v37  ;;  %v1039_v17 = vsel %vm1007_vm14, %v4328_v42, 128.0 }
 0x1b2   : > { %v967_v16 = vpop.xlane.xlu1 %966  ;;  %v965_v2 = vpop.xlane.xlu0 %964 }
 0x1b3   : > { %vm1010_vm11 = vcmp.le.f32.partialorder %v4242_v55, %v967_v16 }
 0x1b4   : > { %v1042_v6 = vsel %vm1010_vm11, %v4328_v42, 128.0  ;;  %vm1009_vm11 = vcmp.le.f32.partialorder %v4245_v14, %v965_v2  ;;  %v3680_v2 = vmov 1.0  }
 0x1b5   : > { %1083 = vmin.xlane.f32.xlu0 %v1035_v4  ;;  %1097 = vmin.xlane.f32.xlu1 %v1042_v6  ;;  %v1041_v50 = vsel %vm1009_vm11, %v4328_v42, 128.0 }
 0x1b6   : > { %v971_v9 = vpop.xlane.xlu1 %970  ;;  %v969_v3 = vpop.xlane.xlu0 %968 }
 0x1b7   : > { %vm1012_vm13 = vcmp.le.f32.partialorder %v4250_v34, %v971_v9 }
 0x1b8   : > { %v1044_v15 = vsel %vm1012_vm13, %v4328_v42, 128.0  ;;  %vm1011_vm13 = vcmp.le.f32.partialorder %v4253_v8, %v969_v3 }
 0x1b9   : > { %1087 = vmin.xlane.f32.xlu0 %v1037_v20  ;;  %1101 = vmin.xlane.f32.xlu1 %v1044_v15  ;;  %v1043_v21 = vsel %vm1011_vm13, %v4328_v42, 128.0 }
 0x1ba   : > { %v975_v55 = vpop.xlane.xlu1 %974  ;;  %v925_v38 = vpop.xlane.xlu0 %924 }
 0x1bb   : > { %vm1014_vm12 = vcmp.le.f32.partialorder %v4259_v58, %v975_v55 }
 0x1bc   : > { %v1046_v28 = vsel %vm1014_vm12, %v4328_v42, 128.0  ;;  %vm989_vm12 = vcmp.le.f32.partialorder %v4263_v7, %v925_v38 }
 0x1bd   : > { %1091 = vmin.xlane.f32.xlu0 %v1039_v17  ;;  %1105 = vmin.xlane.f32.xlu1 %v1046_v28  ;;  %v1021_v8 = vsel %vm989_vm12, %v4328_v42, 128.0 }
 0x1be   : > { %v973_v34 = vpop.xlane.xlu1 %972  ;;  %v927_v58 = vpop.xlane.xlu0 %926 }
 0x1bf   : > { %vm1013_vm15 = vcmp.le.f32.partialorder %v4271_v51, %v973_v34 }
 0x1c0   : > { %v1045_v54 = vsel %vm1013_vm15, %v4328_v42, 128.0  ;;  %vm990_vm15 = vcmp.le.f32.partialorder %v4275_v35, %v927_v58 }
 0x1c1   : > { %1095 = vmin.xlane.f32.xlu0 %v1041_v50  ;;  %1103 = vmin.xlane.f32.xlu1 %v1045_v54  ;;  %v1022_v7 = vsel %vm990_vm15, %v4328_v42, 128.0  ;;  %vm1644_vm15 = vcmask 7168  }
 0x1c2   : > { %v979_v11 = vpop.xlane.xlu1 %978  ;;  %v929_v10 = vpop.xlane.xlu0 %928 }
 0x1c3   : > { %vm1016_vm14 = vcmp.le.f32.partialorder %v4286_v47, %v979_v11 }
 0x1c4   : > { %v1048_v14 = vsel %vm1016_vm14, %v4328_v42, 128.0  ;;  %vm991_vm14 = vcmp.le.f32.partialorder %v4289_v36, %v929_v10 }
 0x1c5   : > { %1099 = vmin.xlane.f32.xlu0 %v1043_v21  ;;  %1109 = vmin.xlane.f32.xlu1 %v1048_v14  ;;  %v1023_v35 = vsel %vm991_vm14, %v4328_v42, 128.0 }
 0x1c6   : > { %v977_v51 = vpop.xlane.xlu1 %976 }
 0x1c7   : > { %vm1015_vm11 = vcmp.le.f32.partialorder %v4266_v53, %v977_v51  ;;  %v931_v53 = vpop.xlane.xlu0 %930 }
 0x1c8   : > { %v1047_v61 = vsel %vm1015_vm11, %v4328_v42, 128.0  ;;  %vm992_vm11 = vcmp.le.f32.partialorder %v4171_v39, %v931_v53 }
 0x1c9   : > { %1055 = vmin.xlane.f32.xlu0 %v1021_v8  ;;  %1107 = vmin.xlane.f32.xlu1 %v1047_v61 }
 0x1ca   : > { %v981_v47 = vpop.xlane.xlu1 %980 }
 0x1cb   : > { %vm1017_vm13 = vcmp.le.f32.partialorder %v4281_v43, %v981_v47  ;;  %v1024_v43 = vsel %vm992_vm11, %v4328_v42, 128.0 }
 0x1cc   : > { %v1049_v30 = vsel %vm1017_vm13, %v4328_v42, 128.0 }
 0x1cd   : > { %1057 = vmin.xlane.f32.xlu0 %v1022_v7  ;;  %1111 = vmin.xlane.f32.xlu1 %v1049_v30 }
 0x1ce   : > { %v983_v18 = vpop.xlane.xlu1 %982 }
 0x1cf   : > { %vm1018_vm12 = vcmp.le.f32.partialorder %v4278_v19, %v983_v18 }
 0x1d0   : > { %v1050_v59 = vsel %vm1018_vm12, %v4328_v42, 128.0 }
 0x1d1   : > { %1059 = vmin.xlane.f32.xlu0 %v1023_v35  ;;  %1113 = vmin.xlane.f32.xlu1 %v1050_v59 }
 0x1d5   : > { %1061 = vmin.xlane.f32.xlu0 %v1024_v43 }
 0x21e   : > { %v1066_v36 = vpop.xlane.xlu1 %1065 }
 0x21f   : > { %v3197_v52 = vtrunc.f32 %v1066_v36  ;;  %vm1122_vm11 = vcmp.eq.f32.partialorder %v4328_v42, %v1066_v36 }
 0x221   : > { %v3198_v24 = vcvt.f32.s32 %v3197_v52 }
 0x222   : > { %v1070_v19 = vpop.xlane.xlu1 %1069 }
 0x223   : > { %1652 = vst.msk [vmem:[%s4416_s26 + $0x38] sm:$0xff] %vm1644_vm15, %v3198_v24  ;;  %v3201_v39 = vtrunc.f32 %v1070_v19 }
 0x225   : > { %v3202_v62 = vcvt.f32.s32 %v3201_v39 }
 0x226   : > { %v1054_v22 = vpop.xlane.xlu0 %1053 }
 0x227   : > { %1654 = vst.msk [vmem:[%s4416_s26 + $0x48] sm:$0xff] %vm1644_vm15, %v3202_v62  ;;  %v3185_v63 = vtrunc.f32 %v1054_v22  ;;  %vm1116_vm14 = vcmp.eq.f32.partialorder %v4328_v42, %v1054_v22 }
 0x229   : > { %v3186_v46 = vcvt.f32.s32 %v3185_v63 }
 0x22a   : > { %v1052_v5 = vpop.xlane.xlu0 %1051  ;;  %v1074_v31 = vpop.xlane.xlu1 %1073 }
 0x22b   : > { %1646 = vst.msk [vmem:[%s4416_s26 + $0x8] sm:$0xff] %vm1644_vm15, %v3186_v46  ;;  %vm1115_vm13 = vcmp.eq.f32.partialorder %v4328_v42, %v1052_v5  ;;  %v3183_v37 = vtrunc.f32 %v1052_v5  ;;  %v3205_v16 = vtrunc.f32 %v1074_v31 }
 0x22c   : > { %3079 = vmatprep.mubr.msk.f32.mxu0 %vm1115_vm13, %v3680_v2 }
 0x22d   : > { %v3184_v4 = vcvt.f32.s32 %v3183_v37  ;;  %v3206_v6 = vcvt.f32.s32 %v3205_v16  ;;  %3080 = vmatmul.mubr.msk.f32.vlgmr.msra.gmra.mrb[32].mxu0 %vm1116_vm14, %v3680_v2  ;;  %vm1124_vm14 = vcmp.eq.f32.partialorder %v4328_v42, %v1070_v19 }
 0x22e   : > { %v1064_v9 = vpop.xlane.xlu0 %1063  ;;  %v1078_v3 = vpop.xlane.xlu1 %1077 }
 0x22f   : > { %1645 = vst.msk [vmem:[%s4416_s26] sm:$0xff] %vm1644_vm15, %v3184_v4  ;;  %1656 = vst.msk [vmem:[%s4416_s26 + $0x58] sm:$0xff] %vm1644_vm15, %v3206_v6  ;;  %v3195_v20 = vtrunc.f32 %v1064_v9  ;;  %v3209_v15 = vtrunc.f32 %v1078_v3  ;;  %vm1121_vm12 = vcmp.eq.f32.partialorder %v4328_v42, %v1064_v9 }
 0x230   : > { %3088 = vmatprep.mubr.msk.f32.mxu1 %vm1121_vm12, %v3680_v2 }
 0x231   : > { %v3196_v55 = vcvt.f32.s32 %v3195_v20  ;;  %v3210_v38 = vcvt.f32.s32 %v3209_v15  ;;  %3089 = vmatmul.mubr.msk.f32.vlgmr.msra.gmra.mrb[0].mxu1 %vm1122_vm11, %v3680_v2  ;;  %vm1126_vm11 = vcmp.eq.f32.partialorder %v4328_v42, %v1074_v31 }
 0x232   : > { %v1068_v17 = vpop.xlane.xlu0 %1067  ;;  %v1082_v28 = vpop.xlane.xlu1 %1081 }
 0x233   : > { %1651 = vst.msk [vmem:[%s4416_s26 + $0x30] sm:$0xff] %vm1644_vm15, %v3196_v55  ;;  %1658 = vst.msk [vmem:[%s4416_s26 + $0x68] sm:$0xff] %vm1644_vm15, %v3210_v38  ;;  %vm1123_vm13 = vcmp.eq.f32.partialorder %v4328_v42, %v1068_v17  ;;  %v3199_v34 = vtrunc.f32 %v1068_v17  ;;  %v3213_v50 = vtrunc.f32 %v1082_v28 }
 0x234   : > { %3091 = vmatprep.mubr.msk.f32.mxu1 %vm1123_vm13, %v3680_v2 }
 0x235   : > { %v3200_v54 = vcvt.f32.s32 %v3199_v34  ;;  %v3214_v58 = vcvt.f32.s32 %v3213_v50  ;;  %3092 = vmatmul.mubr.msk.f32.gmra.mrb[2].mxu1 %vm1124_vm14, %v3680_v2  ;;  %vm1128_vm14 = vcmp.eq.f32.partialorder %v4328_v42, %v1078_v3 }
 0x236   : > { %v1072_v11 = vpop.xlane.xlu0 %1071  ;;  %v1086_v21 = vpop.xlane.xlu1 %1085 }
 0x237   : > { %1653 = vst.msk [vmem:[%s4416_s26 + $0x40] sm:$0xff] %vm1644_vm15, %v3200_v54  ;;  %1660 = vst.msk [vmem:[%s4416_s26 + $0x78] sm:$0xff] %vm1644_vm15, %v3214_v58  ;;  %vm1125_vm12 = vcmp.eq.f32.partialorder %v4328_v42, %v1072_v11  ;;  %v3203_v14 = vtrunc.f32 %v1072_v11  ;;  %v3217_v51 = vtrunc.f32 %v1086_v21 }
 0x238   : > { %3094 = vmatprep.mubr.msk.f32.mxu1 %vm1125_vm12, %v3680_v2 }
 0x239   : > { %v3204_v10 = vcvt.f32.s32 %v3203_v14  ;;  %v3218_v8 = vcvt.f32.s32 %v3217_v51  ;;  %3095 = vmatmul.mubr.msk.f32.gmra.mrb[4].mxu1 %vm1126_vm11, %v3680_v2  ;;  %vm1130_vm11 = vcmp.eq.f32.partialorder %v4328_v42, %v1082_v28 }
 0x23a   : > { %v1076_v61 = vpop.xlane.xlu0 %1075  ;;  %v1090_v47 = vpop.xlane.xlu1 %1089 }
 0x23b   : > { %1655 = vst.msk [vmem:[%s4416_s26 + $0x50] sm:$0xff] %vm1644_vm15, %v3204_v10  ;;  %1662 = vst.msk [vmem:[%s4416_s26 + $0x88] sm:$0xff] %vm1644_vm15, %v3218_v8  ;;  %vm1127_vm13 = vcmp.eq.f32.partialorder %v4328_v42, %v1076_v61  ;;  %v3207_v7 = vtrunc.f32 %v1076_v61  ;;  %v3221_v30 = vtrunc.f32 %v1090_v47 }
 0x23c   : > { %3097 = vmatprep.mubr.msk.f32.mxu1 %vm1127_vm13, %v3680_v2 }
 0x23d   : > { %v3208_v53 = vcvt.f32.s32 %v3207_v7  ;;  %v3222_v18 = vcvt.f32.s32 %v3221_v30  ;;  %3098 = vmatmul.mubr.msk.f32.gmra.mrb[6].mxu1 %vm1128_vm14, %v3680_v2  ;;  %vm1132_vm14 = vcmp.eq.f32.partialorder %v4328_v42, %v1086_v21 }
 0x23e   : > { %v1080_v35 = vpop.xlane.xlu0 %1079  ;;  %v1094_v59 = vpop.xlane.xlu1 %1093 }
 0x23f   : > { %1657 = vst.msk [vmem:[%s4416_s26 + $0x60] sm:$0xff] %vm1644_vm15, %v3208_v53  ;;  %1664 = vst.msk [vmem:[%s4416_s26 + $0x98] sm:$0xff] %vm1644_vm15, %v3222_v18  ;;  %vm1129_vm12 = vcmp.eq.f32.partialorder %v4328_v42, %v1080_v35  ;;  %v3211_v43 = vtrunc.f32 %v1080_v35  ;;  %v3225_v36 = vtrunc.f32 %v1094_v59 }
 0x240   : > { %3100 = vmatprep.mubr.msk.f32.mxu1 %vm1129_vm12, %v3680_v2 }
 0x241   : > { %v3212_v52 = vcvt.f32.s32 %v3211_v43  ;;  %v3226_v24 = vcvt.f32.s32 %v3225_v36  ;;  %3101 = vmatmul.mubr.msk.f32.gmra.mrb[8].mxu1 %vm1130_vm11, %v3680_v2  ;;  %vm1134_vm11 = vcmp.eq.f32.partialorder %v4328_v42, %v1090_v47 }
 0x242   : > { %v1084_v19 = vpop.xlane.xlu0 %1083  ;;  %v1098_v39 = vpop.xlane.xlu1 %1097 }
 0x243   : > { %1659 = vst.msk [vmem:[%s4416_s26 + $0x70] sm:$0xff] %vm1644_vm15, %v3212_v52  ;;  %1666 = vst.msk [vmem:[%s4416_s26 + $0xa8] sm:$0xff] %vm1644_vm15, %v3226_v24  ;;  %vm1131_vm13 = vcmp.eq.f32.partialorder %v4328_v42, %v1084_v19  ;;  %v3215_v62 = vtrunc.f32 %v1084_v19  ;;  %v3229_v22 = vtrunc.f32 %v1098_v39 }
 0x244   : > { %3103 = vmatprep.mubr.msk.f32.mxu1 %vm1131_vm13, %v3680_v2 }
 0x245   : > { %v3216_v63 = vcvt.f32.s32 %v3215_v62  ;;  %v3230_v46 = vcvt.f32.s32 %v3229_v22  ;;  %3104 = vmatmul.mubr.msk.f32.gmra.mrb[10].mxu1 %vm1132_vm14, %v3680_v2  ;;  %vm1136_vm14 = vcmp.eq.f32.partialorder %v4328_v42, %v1094_v59 }
 0x246   : > { %v1088_v5 = vpop.xlane.xlu0 %1087  ;;  %v1102_v31 = vpop.xlane.xlu1 %1101 }
 0x247   : > { %1661 = vst.msk [vmem:[%s4416_s26 + $0x80] sm:$0xff] %vm1644_vm15, %v3216_v63  ;;  %1668 = vst.msk [vmem:[%s4416_s26 + $0xb8] sm:$0xff] %vm1644_vm15, %v3230_v46  ;;  %vm1133_vm12 = vcmp.eq.f32.partialorder %v4328_v42, %v1088_v5  ;;  %v3219_v37 = vtrunc.f32 %v1088_v5  ;;  %v3233_v16 = vtrunc.f32 %v1102_v31 }
 0x248   : > { %3106 = vmatprep.mubr.msk.f32.mxu1 %vm1133_vm12, %v3680_v2 }
 0x249   : > { %v3220_v4 = vcvt.f32.s32 %v3219_v37  ;;  %v3234_v6 = vcvt.f32.s32 %v3233_v16  ;;  %3107 = vmatmul.mubr.msk.f32.gmra.mrb[12].mxu1 %vm1134_vm11, %v3680_v2  ;;  %vm1138_vm11 = vcmp.eq.f32.partialorder %v4328_v42, %v1098_v39 }
 0x24a   : > { %v1092_v9 = vpop.xlane.xlu0 %1091  ;;  %v1106_v3 = vpop.xlane.xlu1 %1105 }
 0x24b   : > { %1663 = vst.msk [vmem:[%s4416_s26 + $0x90] sm:$0xff] %vm1644_vm15, %v3220_v4  ;;  %1670 = vst.msk [vmem:[%s4416_s26 + $0xc8] sm:$0xff] %vm1644_vm15, %v3234_v6  ;;  %vm1135_vm13 = vcmp.eq.f32.partialorder %v4328_v42, %v1092_v9  ;;  %v3223_v20 = vtrunc.f32 %v1092_v9  ;;  %v3237_v15 = vtrunc.f32 %v1106_v3 }
 0x24c   : > { %3109 = vmatprep.mubr.msk.f32.mxu1 %vm1135_vm13, %v3680_v2 }
 0x24d   : > { %v3224_v55 = vcvt.f32.s32 %v3223_v20  ;;  %v3238_v38 = vcvt.f32.s32 %v3237_v15  ;;  %3110 = vmatmul.mubr.msk.f32.gmra.mrb[14].mxu1 %vm1136_vm14, %v3680_v2  ;;  %vm1140_vm14 = vcmp.eq.f32.partialorder %v4328_v42, %v1102_v31 }
 0x24e   : > { %v1096_v17 = vpop.xlane.xlu0 %1095  ;;  %v1104_v28 = vpop.xlane.xlu1 %1103 }
 0x24f   : > { %1665 = vst.msk [vmem:[%s4416_s26 + $0xa0] sm:$0xff] %vm1644_vm15, %v3224_v55  ;;  %1672 = vst.msk [vmem:[%s4416_s26 + $0xd8] sm:$0xff] %vm1644_vm15, %v3238_v38  ;;  %vm1137_vm12 = vcmp.eq.f32.partialorder %v4328_v42, %v1096_v17  ;;  %v3227_v34 = vtrunc.f32 %v1096_v17  ;;  %v3235_v50 = vtrunc.f32 %v1104_v28 }
 0x250   : > { %3112 = vmatprep.mubr.msk.f32.mxu1 %vm1137_vm12, %v3680_v2  ;;  %vm1141_vm12 = vcmp.eq.f32.partialorder %v4328_v42, %v1104_v28 }
 0x251   : > { %v3228_v54 = vcvt.f32.s32 %v3227_v34  ;;  %v3236_v58 = vcvt.f32.s32 %v3235_v50  ;;  %3113 = vmatmul.mubr.msk.f32.gmra.mrb[16].mxu1 %vm1138_vm11, %v3680_v2 }
 0x252   : > { %v1100_v11 = vpop.xlane.xlu0 %1099  ;;  %v1110_v21 = vpop.xlane.xlu1 %1109 }
 0x253   : > { %1667 = vst.msk [vmem:[%s4416_s26 + $0xb0] sm:$0xff] %vm1644_vm15, %v3228_v54  ;;  %1671 = vst.msk [vmem:[%s4416_s26 + $0xd0] sm:$0xff] %vm1644_vm15, %v3236_v58  ;;  %vm1139_vm13 = vcmp.eq.f32.partialorder %v4328_v42, %v1100_v11  ;;  %v3231_v14 = vtrunc.f32 %v1100_v11  ;;  %v3241_v51 = vtrunc.f32 %v1110_v21 }
 0x254   : > { %3115 = vmatprep.mubr.msk.f32.mxu1 %vm1139_vm13, %v3680_v2  ;;  %vm1142_vm13 = vcmp.eq.f32.partialorder %v4328_v42, %v1106_v3 }
 0x255   : > { %v3232_v10 = vcvt.f32.s32 %v3231_v14  ;;  %v3242_v8 = vcvt.f32.s32 %v3241_v51  ;;  %3116 = vmatmul.mubr.msk.f32.gmra.mrb[18].mxu1 %vm1140_vm14, %v3680_v2 }
 0x256   : > { %v1056_v61 = vpop.xlane.xlu0 %1055  ;;  %3118 = vmatprep.mubr.msk.f32.mxu1 %vm1141_vm12, %v3680_v2  ;;  %v1108_v47 = vpop.xlane.xlu1 %1107 }
 0x257   : > { %1669 = vst.msk [vmem:[%s4416_s26 + $0xc0] sm:$0xff] %vm1644_vm15, %v3232_v10  ;;  %1674 = vst.msk [vmem:[%s4416_s26 + $0xe8] sm:$0xff] %vm1644_vm15, %v3242_v8  ;;  %vm1117_vm11 = vcmp.eq.f32.partialorder %v4328_v42, %v1056_v61  ;;  %v3187_v7 = vtrunc.f32 %v1056_v61  ;;  %v3239_v30 = vtrunc.f32 %v1108_v47  ;;  %vm1143_vm14 = vcmp.eq.f32.partialorder %v4328_v42, %v1108_v47 }
 0x258   : > { %3082 = vmatprep.mubr.msk.f32.mxu0 %vm1117_vm11, %v3680_v2  ;;  %vm1144_vm11 = vcmp.eq.f32.partialorder %v4328_v42, %v1110_v21 }
 0x259   : > { %v3188_v53 = vcvt.f32.s32 %v3187_v7  ;;  %v3240_v18 = vcvt.f32.s32 %v3239_v30  ;;  %3119 = vmatmul.mubr.msk.f32.gmra.mrb[20].mxu1 %vm1142_vm13, %v3680_v2 }
 0x25a   : > { %v1058_v35 = vpop.xlane.xlu0 %1057  ;;  %3121 = vmatprep.mubr.msk.f32.mxu1 %vm1143_vm14, %v3680_v2  ;;  %v1112_v59 = vpop.xlane.xlu1 %1111 }
 0x25b   : > { %1647 = vst.msk [vmem:[%s4416_s26 + $0x10] sm:$0xff] %vm1644_vm15, %v3188_v53  ;;  %1673 = vst.msk [vmem:[%s4416_s26 + $0xe0] sm:$0xff] %vm1644_vm15, %v3240_v18  ;;  %vm1118_vm12 = vcmp.eq.f32.partialorder %v4328_v42, %v1058_v35  ;;  %v3189_v43 = vtrunc.f32 %v1058_v35  ;;  %v3243_v36 = vtrunc.f32 %v1112_v59  ;;  %vm1145_vm13 = vcmp.eq.f32.partialorder %v4328_v42, %v1112_v59 }
 0x25c   : > { %3083 = vmatmul.mubr.msk.f32.gmra.mrb[34].mxu0 %vm1118_vm12, %v3680_v2 }
 0x25d   : > { %v3190_v52 = vcvt.f32.s32 %v3189_v43  ;;  %v3244_v24 = vcvt.f32.s32 %v3243_v36  ;;  %3122 = vmatmul.mubr.msk.f32.gmra.mrb[22].mxu1 %vm1144_vm11, %v3680_v2 }
 0x25e   : > { %v1060_v19 = vpop.xlane.xlu0 %1059  ;;  %3124 = vmatprep.mubr.msk.f32.mxu1 %vm1145_vm13, %v3680_v2  ;;  %v1114_v39 = vpop.xlane.xlu1 %1113 }
 0x25f   : > { %1648 = vst.msk [vmem:[%s4416_s26 + $0x18] sm:$0xff] %vm1644_vm15, %v3190_v52  ;;  %1675 = vst.msk [vmem:[%s4416_s26 + $0xf0] sm:$0xff] %vm1644_vm15, %v3244_v24  ;;  %vm1119_vm14 = vcmp.eq.f32.partialorder %v4328_v42, %v1060_v19  ;;  %v3191_v62 = vtrunc.f32 %v1060_v19  ;;  %vm1146_vm12 = vcmp.eq.f32.partialorder %v4328_v42, %v1114_v39  ;;  %v3245_v22 = vtrunc.f32 %v1114_v39 }
 0x260   : > { %3085 = vmatprep.mubr.msk.f32.mxu0 %vm1119_vm14, %v3680_v2 }
 0x261   : > { %v3192_v63 = vcvt.f32.s32 %v3191_v62  ;;  %v3246_v46 = vcvt.f32.s32 %v3245_v22  ;;  %3125 = vmatmul.mubr.msk.f32.gmra.mrb[24].mxu1 %vm1146_vm12, %v3680_v2 }
 0x262   : > { %v1062_v5 = vpop.xlane.xlu0 %1061 }
 0x263   : > { %1649 = vst.msk [vmem:[%s4416_s26 + $0x20] sm:$0xff] %vm1644_vm15, %v3192_v63  ;;  %1676 = vst.msk [vmem:[%s4416_s26 + $0xf8] sm:$0xff] %vm1644_vm15, %v3246_v46  ;;  %vm1120_vm11 = vcmp.eq.f32.partialorder %v4328_v42, %v1062_v5  ;;  %v3193_v31 = vtrunc.f32 %v1062_v5 }
 0x264   : > { %3086 = vmatmul.mubr.msk.f32.gmra.mrb[36].mxu0 %vm1120_vm11, %v3680_v2 }
 0x265   : > { %v3194_v37 = vcvt.f32.s32 %v3193_v31 }
 0x267   : > { %1650 = vst.msk [vmem:[%s4416_s26 + $0x28] sm:$0xff] %vm1644_vm15, %v3194_v37 }
 0x300   : > { %v3081_v16 = vpop.f32.mrb[32].mxu0 }
 0x301   : > { %v1453_v4 = vsub.f32 %v3081_v16, %v3808_v25  ;;  %1678 = vst.msk [vmem:[%s4548_s21 + $0x8] sm:$0xff] %vm527_vm0, %v3081_v16  ;;  %v1293_v6 = vpop.f32.mrb[33].mxu0 }
 0x302   : > { %v1452_v42 = vsub.f32 %v1293_v6, %v3799_v23  ;;  %1677 = vst.msk [vmem:[%s4548_s21] sm:$0xff] %vm527_vm0, %v1293_v6 }
 0x303   : > { %v1485_v2 = vmul.f32 %v1453_v4, %v1453_v4 }
 0x304   : > { %v1484_v9 = vmul.f32 %v1452_v42, %v1452_v42  ;;  %v4555_v25 = vpop.f32.mrb[0].mxu1 }
 0x305   : > { %1684 = vst.msk [vmem:[%s4548_s21 + $0x38] sm:$0xff] %vm527_vm0, %v4555_v25  ;;  %v4560_v3 = vpop.f32.mrb[1].mxu1  ;;  %v1519_v20 = vsel %vm527_vm0, %v1485_v2, 0.0  ;;  %v1459_v63 = vsub.f32 %v4555_v25, %v3879_v48 }
 0x306   : > { %1683 = vst.msk [vmem:[%s4548_s21 + $0x30] sm:$0xff] %vm527_vm0, %v4560_v3  ;;  %1520 = vadd.xlane.f32.xlu1 %v1519_v20  ;;  %v1516_v23 = vsel %vm527_vm0, %v1484_v9, 0.0  ;;  %v1458_v31 = vsub.f32 %v4560_v3, %v3859_v41 }
 0x307   : > { %1517 = vadd.xlane.f32.xlu0 %v1516_v23  ;;  %v1491_v6 = vmul.f32 %v1459_v63, %v1459_v63  ;;  %v5430_v63 = vld [vmem:[#allocation28_spill] sm:$0xff] }
 0x308   : > { %v4567_v15 = vpop.f32.mrb[2].mxu1  ;;  %v1490_v2 = vmul.f32 %v1458_v31, %v1458_v31 }
 0x309   : > { %1686 = vst.msk [vmem:[%s4548_s21 + $0x48] sm:$0xff] %vm527_vm0, %v4567_v15  ;;  %v4572_v55 = vpop.f32.mrb[3].mxu1  ;;  %v1461_v42 = vsub.f32 %v4567_v15, %v3903_v56  ;;  %v1537_v25 = vsel %vm527_vm0, %v1491_v6, 0.0 }
 0x30a   : > { %1685 = vst.msk [vmem:[%s4548_s21 + $0x40] sm:$0xff] %vm527_vm0, %v4572_v55  ;;  %v1534_v20 = vsel %vm527_vm0, %v1490_v2, 0.0  ;;  %v5434_v2 = vld [vmem:[#allocation36_spill] sm:$0xff] }
 0x30b   : > { %v1493_v41 = vmul.f32 %v1461_v42, %v1461_v42 }
 0x30c   : > { %v4577_v38 = vpop.f32.mrb[4].mxu1 }
 0x30d   : > { %1688 = vst.msk [vmem:[%s4548_s21 + $0x58] sm:$0xff] %vm527_vm0, %v4577_v38  ;;  %v4582_v17 = vpop.f32.mrb[5].mxu1  ;;  %v1543_v15 = vsel %vm527_vm0, %v1493_v41, 0.0 }
 0x30e   : > { %1687 = vst.msk [vmem:[%s4548_s21 + $0x50] sm:$0xff] %vm527_vm0, %v4582_v17  ;;  %v1462_v56 = vsub.f32 %v4582_v17, %v3907_v57 }
 0x310   : > { %v4587_v28 = vpop.f32.mrb[6].mxu1 }
 0x311   : > { %1690 = vst.msk [vmem:[%s4548_s21 + $0x68] sm:$0xff] %vm527_vm0, %v4587_v28  ;;  %v4592_v34 = vpop.f32.mrb[7].mxu1 }
 0x312   : > { %1689 = vst.msk [vmem:[%s4548_s21 + $0x60] sm:$0xff] %vm527_vm0, %v4592_v34 }
 0x314   : > { %v4597_v50 = vpop.f32.mrb[8].mxu1 }
 0x315   : > { %1692 = vst.msk [vmem:[%s4548_s21 + $0x78] sm:$0xff] %vm527_vm0, %v4597_v50  ;;  %v4602_v54 = vpop.f32.mrb[9].mxu1  ;;  %v1467_v57 = vsub.f32 %v4597_v50, %v3975_v27 }
 0x316   : > { %1691 = vst.msk [vmem:[%s4548_s21 + $0x70] sm:$0xff] %vm527_vm0, %v4602_v54 }
 0x318   : > { %v4607_v58 = vpop.f32.mrb[10].mxu1 }
 0x319   : > { %1694 = vst.msk [vmem:[%s4548_s21 + $0x88] sm:$0xff] %vm527_vm0, %v4607_v58  ;;  %v4612_v11 = vpop.f32.mrb[11].mxu1 }
 0x31a   : > { %1693 = vst.msk [vmem:[%s4548_s21 + $0x80] sm:$0xff] %vm527_vm0, %v4612_v11  ;;  %v1468_v27 = vsub.f32 %v4612_v11, %v3979_v29  ;;  %v5429_v29 = vld [vmem:[#allocation31_spill] sm:$0xff] }
 0x31c   : > { %v4617_v21 = vpop.f32.mrb[12].mxu1 }
 0x31d   : > { %1696 = vst.msk [vmem:[%s4548_s21 + $0x98] sm:$0xff] %vm527_vm0, %v4617_v21  ;;  %v4622_v14 = vpop.f32.mrb[13].mxu1 }
 0x31e   : > { %1695 = vst.msk [vmem:[%s4548_s21 + $0x90] sm:$0xff] %vm527_vm0, %v4622_v14 }
 0x320   : > { %v4627_v51 = vpop.f32.mrb[14].mxu1 }
 0x321   : > { %1698 = vst.msk [vmem:[%s4548_s21 + $0xa8] sm:$0xff] %vm527_vm0, %v4627_v51  ;;  %v4632_v10 = vpop.f32.mrb[15].mxu1  ;;  %v1473_v11 = vsub.f32 %v4627_v51, %v5429_v29 }
 0x322   : > { %1697 = vst.msk [vmem:[%s4548_s21 + $0xa0] sm:$0xff] %vm527_vm0, %v4632_v10 }
 0x324   : > { %v4637_v8 = vpop.f32.mrb[16].mxu1 }
 0x325   : > { %1700 = vst.msk [vmem:[%s4548_s21 + $0xb8] sm:$0xff] %vm527_vm0, %v4637_v8  ;;  %v4642_v61 = vpop.f32.mrb[17].mxu1 }
 0x326   : > { %1699 = vst.msk [vmem:[%s4548_s21 + $0xb0] sm:$0xff] %vm527_vm0, %v4642_v61 }
 0x328   : > { %v4647_v47 = vpop.f32.mrb[18].mxu1 }
 0x329   : > { %1702 = vst.msk [vmem:[%s4548_s21 + $0xc8] sm:$0xff] %vm527_vm0, %v4647_v47  ;;  %v4652_v7 = vpop.f32.mrb[19].mxu1 }
 0x32a   : > { %1701 = vst.msk [vmem:[%s4548_s21 + $0xc0] sm:$0xff] %vm527_vm0, %v4652_v7 }
 0x32c   : > { %v4657_v30 = vpop.f32.mrb[20].mxu1 }
 0x32d   : > { %1704 = vst.msk [vmem:[%s4548_s21 + $0xd8] sm:$0xff] %vm527_vm0, %v4657_v30  ;;  %v4662_v53 = vpop.f32.mrb[21].mxu1 }
 0x32e   : > { %1703 = vst.msk [vmem:[%s4548_s21 + $0xd0] sm:$0xff] %vm527_vm0, %v4662_v53 }
 0x32f   : > { %v3084_v18 = vpop.f32.mrb[34].mxu0 }
 0x330   : > { %v1455_v35 = vsub.f32 %v3084_v18, %v3831_v32  ;;  %1680 = vst.msk [vmem:[%s4548_s21 + $0x18] sm:$0xff] %vm527_vm0, %v3084_v18  ;;  %v1303_v59 = vpop.f32.mrb[35].mxu0  ;;  %v4670_v43 = vpop.f32.mrb[22].mxu1 }
 0x331   : > { %v1454_v36 = vsub.f32 %v1303_v59, %v3812_v26  ;;  %1679 = vst.msk [vmem:[%s4548_s21 + $0x10] sm:$0xff] %vm527_vm0, %v1303_v59  ;;  %1706 = vst.msk [vmem:[%s4548_s21 + $0xe8] sm:$0xff] %vm527_vm0, %v4670_v43  ;;  %v4678_v52 = vpop.f32.mrb[23].mxu1  ;;  %v1499_v59 = vmul.f32 %v1467_v57, %v1467_v57 }
 0x332   : > { %v1487_v24 = vmul.f32 %v1455_v35, %v1455_v35  ;;  %1705 = vst.msk [vmem:[%s4548_s21 + $0xe0] sm:$0xff] %vm527_vm0, %v4678_v52 }
 0x333   : > { %v1486_v32 = vmul.f32 %v1454_v36, %v1454_v36 }
 0x334   : > { %v4683_v19 = vpop.f32.mrb[24].mxu1  ;;  %v1525_v39 = vsel %vm527_vm0, %v1487_v24, 0.0 }
 0x335   : > { %1708 = vst.msk [vmem:[%s4548_s21 + $0xf8] sm:$0xff] %vm527_vm0, %v4683_v19  ;;  %1526 = vadd.xlane.f32.xlu1 %v1525_v39  ;;  %v4689_v26 = vpop.f32.mrb[25].mxu1  ;;  %v1522_v62 = vsel %vm527_vm0, %v1486_v32, 0.0  ;;  %v1500_v32 = vmul.f32 %v1468_v27, %v1468_v27 }
 0x336   : > { %1707 = vst.msk [vmem:[%s4548_s21 + $0xf0] sm:$0xff] %vm527_vm0, %v4689_v26  ;;  %1523 = vadd.xlane.f32.xlu0 %v1522_v62 }
 0x337   : > { %v3087_v22 = vpop.f32.mrb[36].mxu0 }
 0x338   : > { %v1457_v46 = vsub.f32 %v3087_v22, %v3855_v40  ;;  %1682 = vst.msk [vmem:[%s4548_s21 + $0x28] sm:$0xff] %vm527_vm0, %v3087_v22  ;;  %v1313_v5 = vpop.f32.mrb[37].mxu0  ;;  %v1460_v40 = vsub.f32 %v4572_v55, %v3883_v49  ;;  %v1465_v49 = vsub.f32 %v4587_v28, %v3951_v12  ;;  %v1494_v55 = vmul.f32 %v1462_v56, %v1462_v56 }
 0x339   : > { %v1456_v37 = vsub.f32 %v1313_v5, %v3835_v33  ;;  %1681 = vst.msk [vmem:[%s4548_s21 + $0x20] sm:$0xff] %vm527_vm0, %v1313_v5  ;;  %v1463_v33 = vsub.f32 %v4577_v38, %v3927_v0  ;;  %v1464_v0 = vsub.f32 %v4592_v34, %v3931_v1  ;;  %v1466_v12 = vsub.f32 %v4602_v54, %v3955_v13 }
 0x33a   : > { %v1489_v16 = vmul.f32 %v1457_v46, %v1457_v46  ;;  %v1492_v3 = vmul.f32 %v1460_v40, %v1460_v40  ;;  %v1497_v18 = vmul.f32 %v1465_v49, %v1465_v49  ;;  %v1546_v28 = vsel %vm527_vm0, %v1494_v55, 0.0  ;;  %v5438_v55 = vld [vmem:[#allocation44_spill] sm:$0xff] }
 0x33b   : > { %v1488_v4 = vmul.f32 %v1456_v37, %v1456_v37  ;;  %v1495_v23 = vmul.f32 %v1463_v33, %v1463_v33  ;;  %v1496_v35 = vmul.f32 %v1464_v0, %v1464_v0  ;;  %v1469_v1 = vsub.f32 %v4607_v58, %v3999_v44  ;;  %v5432_v37 = vld [vmem:[#allocation32_spill] sm:$0xff] }
 0x33c   : > { %v1531_v48 = vsel %vm527_vm0, %v1489_v16, 0.0  ;;  %v1540_v38 = vsel %vm527_vm0, %v1492_v3, 0.0  ;;  %v1555_v34 = vsel %vm527_vm0, %v1497_v18, 0.0  ;;  %v1498_v36 = vmul.f32 %v1466_v12, %v1466_v12  ;;  %v5436_v3 = vld [vmem:[#allocation40_spill] sm:$0xff] }
 0x33d   : > { %1532 = vadd.xlane.f32.xlu1 %v1531_v48  ;;  %v1528_v9 = vsel %vm527_vm0, %v1488_v4, 0.0  ;;  %v1549_v17 = vsel %vm527_vm0, %v1495_v23, 0.0  ;;  %v1552_v50 = vsel %vm527_vm0, %v1496_v35, 0.0  ;;  %v1501_v24 = vmul.f32 %v1469_v1, %v1469_v1  ;;  %v5440_v35 = vld [vmem:[#allocation47_spill] sm:$0xff] }
 0x33e   : > { %1529 = vadd.xlane.f32.xlu0 %v1528_v9  ;;  %v1471_v13 = vsub.f32 %v4617_v21, %v4023_v60  ;;  %v1561_v54 = vsel %vm527_vm0, %v1499_v59, 0.0  ;;  %v1470_v44 = vsub.f32 %v4622_v14, %v4003_v45  ;;  %v1558_v58 = vsel %vm527_vm0, %v1498_v36, 0.0  ;;  %v5431_v45 = vld [vmem:[#allocation35_spill] sm:$0xff] }
 0x33f   : > { %v1567_v62 = vsel %vm527_vm0, %v1501_v24, 0.0  ;;  %v1472_v60 = vsub.f32 %v4632_v10, %v5430_v63  ;;  %v1564_v21 = vsel %vm527_vm0, %v1500_v32, 0.0  ;;  %v1505_v46 = vmul.f32 %v1473_v11, %v1473_v11  ;;  %v5433_v10 = vld [vmem:[#allocation39_spill] sm:$0xff] }
 0x340   : > { %v1503_v39 = vmul.f32 %v1471_v13, %v1471_v13  ;;  %v1502_v22 = vmul.f32 %v1470_v44, %v1470_v44  ;;  %v1475_v14 = vsub.f32 %v4637_v8, %v5431_v45  ;;  %v1474_v51 = vsub.f32 %v4642_v61, %v5432_v37  ;;  %v5435_v61 = vld [vmem:[#allocation43_spill] sm:$0xff] }
 0x341   : > { %1538 = vadd.xlane.f32.xlu1 %v1537_v25  ;;  %v1504_v31 = vmul.f32 %v1472_v60, %v1472_v60  ;;  %v1477_v6 = vsub.f32 %v4647_v47, %v5433_v10  ;;  %v1579_v42 = vsel %vm527_vm0, %v1505_v46, 0.0  ;;  %v1476_v8 = vsub.f32 %v4652_v7, %v5434_v2  ;;  %v5437_v7 = vld [vmem:[#allocation46_spill] sm:$0xff]  ;;  %v5451_v2 = vld [vmem:[#allocation16_spill] sm:$0xff] }
 0x342   : > { %1535 = vadd.xlane.f32.xlu0 %v1534_v20  ;;  %v1573_v5 = vsel %vm527_vm0, %v1503_v39, 0.0  ;;  %v1570_v16 = vsel %vm527_vm0, %v1502_v22, 0.0  ;;  %v1507_v4 = vmul.f32 %v1475_v14, %v1475_v14  ;;  %v1506_v48 = vmul.f32 %v1474_v51, %v1474_v51 }
 0x343   : > { %v1576_v40 = vsel %vm527_vm0, %v1504_v31, 0.0  ;;  %v1509_v9 = vmul.f32 %v1477_v6, %v1477_v6  ;;  %v1479_v41 = vsub.f32 %v4657_v30, %v5435_v61  ;;  %v1508_v25 = vmul.f32 %v1476_v8, %v1476_v8 }
 0x344   : > { %v1585_v33 = vsel %vm527_vm0, %v1507_v4, 0.0  ;;  %v1478_v47 = vsub.f32 %v4662_v53, %v5436_v3  ;;  %v1582_v56 = vsel %vm527_vm0, %v1506_v48, 0.0  ;;  %v1481_v23 = vsub.f32 %v4670_v43, %v5437_v7  ;;  %v5439_v53 = vld [vmem:[#allocation48_spill] sm:$0xff] }
 0x345   : > { %1544 = vadd.xlane.f32.xlu1 %v1543_v15  ;;  %v1511_v20 = vmul.f32 %v1479_v41, %v1479_v41  ;;  %v1591_v49 = vsel %vm527_vm0, %v1509_v9, 0.0  ;;  %v1480_v30 = vsub.f32 %v4678_v52, %v5438_v55  ;;  %v1588_v0 = vsel %vm527_vm0, %v1508_v25, 0.0  ;;  %v5453_v9 = vld [vmem:[#allocation15_spill] sm:$0xff]  ;;  %v5459_v7 = vld [vmem:[#allocation20_spill] sm:$0xff] }
 0x346   : > { %1541 = vadd.xlane.f32.xlu0 %v1540_v38  ;;  %v1510_v15 = vmul.f32 %v1478_v47, %v1478_v47  ;;  %v1513_v38 = vmul.f32 %v1481_v23, %v1481_v23  ;;  %v1483_v18 = vsub.f32 %v4683_v19, %v5439_v53  ;;  %v1482_v43 = vsub.f32 %v4689_v26, %v5440_v35  ;;  %v5457_v47 = vld [vmem:[#allocation17_spill] sm:$0xff]  ;;  %v5467_v35 = vld [vmem:[#allocation24_spill] sm:$0xff] }
 0x347   : > { %v1597_v57 = vsel %vm527_vm0, %v1511_v20, 0.0 }
 0x348   : > { %v1594_v12 = vsel %vm527_vm0, %v1510_v15, 0.0  ;;  %v1515_v52 = vmul.f32 %v1483_v18, %v1483_v18  ;;  %v1514_v59 = vmul.f32 %v1482_v43, %v1482_v43  ;;  %v5461_v15 = vld [vmem:[#allocation19_spill] sm:$0xff]  ;;  %v5465_v18 = vld [vmem:[#allocation21_spill] sm:$0xff] }
 0x349   : > { %1550 = vadd.xlane.f32.xlu1 %v1549_v17  ;;  %v1512_v17 = vmul.f32 %v1480_v30, %v1480_v30 }
 0x34a   : > { %1547 = vadd.xlane.f32.xlu0 %v1546_v28  ;;  %v1603_v28 = vsel %vm527_vm0, %v1513_v38, 0.0  ;;  %v1609_v19 = vsel %vm527_vm0, %v1515_v52, 0.0  ;;  %v5469_v52 = vld [vmem:[#allocation23_spill] sm:$0xff] }
 0x34b   : > { %v1600_v1 = vsel %vm527_vm0, %v1512_v17, 0.0 }
 0x34d   : > { %1556 = vadd.xlane.f32.xlu1 %v1555_v34  ;;  %v1606_v34 = vsel %vm527_vm0, %v1514_v59, 0.0  ;;  %vm5452_vm0 = vcmp.lt.s32.totalorder %v5451_v2, 500 }
 0x34e   : > { %1553 = vadd.xlane.f32.xlu0 %v1552_v50 }
 0x351   : > { %1562 = vadd.xlane.f32.xlu1 %v1561_v54 }
 0x352   : > { %1559 = vadd.xlane.f32.xlu0 %v1558_v58 }
 0x355   : > { %1568 = vadd.xlane.f32.xlu1 %v1567_v62 }
 0x356   : > { %1565 = vadd.xlane.f32.xlu0 %v1564_v21 }
 0x359   : > { %1574 = vadd.xlane.f32.xlu1 %v1573_v5 }
 0x35a   : > { %1571 = vadd.xlane.f32.xlu0 %v1570_v16 }
 0x35d   : > { %1580 = vadd.xlane.f32.xlu1 %v1579_v42 }
 0x35e   : > { %1577 = vadd.xlane.f32.xlu0 %v1576_v40 }
 0x361   : > { %1586 = vadd.xlane.f32.xlu1 %v1585_v33  ;;  %v5455_v33 = vld [vmem:[#allocation18_spill] sm:$0xff] }
 0x362   : > { %1583 = vadd.xlane.f32.xlu0 %v1582_v56 }
 0x365   : > { %1592 = vadd.xlane.f32.xlu1 %v1591_v49 }
 0x366   : > { %1589 = vadd.xlane.f32.xlu0 %v1588_v0  ;;  %v5463_v0 = vld [vmem:[#allocation22_spill] sm:$0xff] }
 0x369   : > { %1598 = vadd.xlane.f32.xlu1 %v1597_v57 }
 0x36a   : > { %1595 = vadd.xlane.f32.xlu0 %v1594_v12 }
 0x36d   : > { %1604 = vadd.xlane.f32.xlu1 %v1603_v28 }
 0x36e   : > { %1601 = vadd.xlane.f32.xlu0 %v1600_v1  ;;  %v5471_v1 = vld [vmem:[#allocation26_spill] sm:$0xff] }
 0x371   : > { %1610 = vadd.xlane.f32.xlu1 %v1609_v19 }
 0x372   : > { %1607 = vadd.xlane.f32.xlu0 %v1606_v34 }
 0x393   : > { %v1521_v26 = vpop.xlane.xlu1 %1520 }
 0x394   : > { %v1710_v27 = vsel %vm364_vm2, %v1521_v26, 0.0  ;;  %v1518_v50 = vpop.xlane.xlu0 %1517  ;;  %vm5456_vm2 = vcmp.lt.s32.totalorder %v5455_v33, 500  ;;  %v5473_v26 = vld [vmem:[#allocation25_spill] sm:$0xff] }
 0x395   : > { %1742 = vst.msk [vmem:[%s4784_s27 + $0x8] sm:$0xff] %vm1644_vm15, %v1710_v27  ;;  %v1709_v13 = vsel %vm363_vm1, %v1518_v50, 0.0  ;;  %vm5454_vm1 = vcmp.lt.s32.totalorder %v5453_v9, 500  ;;  %vm5474_vm13 = vcmp.lt.s32.totalorder %v5473_v26, 500  ;;  %v5475_v50 = vld [vmem:[#allocation29_spill] sm:$0xff] }
 0x396   : > { %1741 = vst.msk [vmem:[%s4784_s27] sm:$0xff] %vm1644_vm15, %v1709_v13  ;;  %vm5476_vm14 = vcmp.lt.s32.totalorder %v5475_v50, 500 }
 0x3c2   : > { %v1527_v54 = vpop.xlane.xlu1 %1526 }
 0x3c3   : > { %v1712_v44 = vsel %vm366_vm4, %v1527_v54, 0.0  ;;  %v1524_v58 = vpop.xlane.xlu0 %1523  ;;  %vm5460_vm4 = vcmp.lt.s32.totalorder %v5459_v7, 500  ;;  %v5477_v54 = vld [vmem:[#allocation27_spill] sm:$0xff] }
 0x3c4   : > { %1744 = vst.msk [vmem:[%s4784_s27 + $0x18] sm:$0xff] %vm1644_vm15, %v1712_v44  ;;  %v1711_v29 = vsel %vm365_vm3, %v1524_v58, 0.0  ;;  %vm5458_vm3 = vcmp.lt.s32.totalorder %v5457_v47, 500  ;;  %vm5478_vm12 = vcmp.lt.s32.totalorder %v5477_v54, 500  ;;  %v5479_v58 = vld [vmem:[#allocation33_spill] sm:$0xff] }
 0x3c5   : > { %1743 = vst.msk [vmem:[%s4784_s27 + $0x10] sm:$0xff] %vm1644_vm15, %v1711_v29  ;;  %vm5480_vm11 = vcmp.lt.s32.totalorder %v5479_v58, 500 }
 0x3ca   : > { %v1533_v11 = vpop.xlane.xlu1 %1532 }
 0x3cb   : > { %v1714_v22 = vsel %vm368_vm6, %v1533_v11, 0.0  ;;  %v1530_v63 = vpop.xlane.xlu0 %1529  ;;  %vm5464_vm6 = vcmp.lt.s32.totalorder %v5463_v0, 500  ;;  %v5481_v11 = vld [vmem:[#allocation30_spill] sm:$0xff] }
 0x3cc   : > { %1746 = vst.msk [vmem:[%s4784_s27 + $0x28] sm:$0xff] %vm1644_vm15, %v1714_v22  ;;  %v1713_v21 = vsel %vm367_vm5, %v1530_v63, 0.0  ;;  %vm5462_vm5 = vcmp.lt.s32.totalorder %v5461_v15, 500  ;;  %v5483_v63 = vld [vmem:[#allocation37_spill] sm:$0xff] }
 0x3cd   : > { %1745 = vst.msk [vmem:[%s4784_s27 + $0x20] sm:$0xff] %vm1644_vm15, %v1713_v21 }
 0x3ce   : > { %v1539_v46 = vpop.xlane.xlu1 %1538 }
 0x3cf   : > { %v1716_v14 = vsel %vm370_vm8, %v1539_v46, 0.0  ;;  %v1536_v5 = vpop.xlane.xlu0 %1535  ;;  %vm5468_vm8 = vcmp.lt.s32.totalorder %v5467_v35, 500  ;;  %v5485_v46 = vld [vmem:[#allocation34_spill] sm:$0xff] }
 0x3d0   : > { %1748 = vst.msk [vmem:[%s4784_s27 + $0x38] sm:$0xff] %vm1644_vm15, %v1716_v14  ;;  %v1715_v37 = vsel %vm369_vm7, %v1536_v5, 0.0  ;;  %vm5466_vm7 = vcmp.lt.s32.totalorder %v5465_v18, 500  ;;  %v5487_v5 = vld [vmem:[#allocation41_spill] sm:$0xff] }
 0x3d1   : > { %1747 = vst.msk [vmem:[%s4784_s27 + $0x30] sm:$0xff] %vm1644_vm15, %v1715_v37 }
 0x3d2   : > { %v1545_v51 = vpop.xlane.xlu1 %1544 }
 0x3d3   : > { %v1718_v4 = vsel %vm372_vm10, %v1545_v51, 0.0  ;;  %v1542_v10 = vpop.xlane.xlu0 %1541  ;;  %vm5472_vm10 = vcmp.lt.s32.totalorder %v5471_v1, 500  ;;  %v5489_v51 = vld [vmem:[#allocation38_spill] sm:$0xff] }
 0x3d4   : > { %1750 = vst.msk [vmem:[%s4784_s27 + $0x48] sm:$0xff] %vm1644_vm15, %v1718_v4  ;;  %v1717_v42 = vsel %vm371_vm9, %v1542_v10, 0.0  ;;  %vm5470_vm9 = vcmp.lt.s32.totalorder %v5469_v52, 500  ;;  %v5491_v10 = vld [vmem:[#allocation45_spill] sm:$0xff] }
 0x3d5   : > { %1749 = vst.msk [vmem:[%s4784_s27 + $0x40] sm:$0xff] %vm1644_vm15, %v1717_v42 }
 0x3d6   : > { %v1551_v48 = vpop.xlane.xlu1 %1550 }
 0x3d7   : > { %v1720_v8 = vsel %vm5452_vm0, %v1551_v48, 0.0  ;;  %v1548_v40 = vpop.xlane.xlu0 %1547  ;;  %vm5482_vm0 = vcmp.lt.s32.totalorder %v5481_v11, 500  ;;  %v5493_v48 = vld [vmem:[#allocation42_spill] sm:$0xff] }
 0x3d8   : > { %1752 = vst.msk [vmem:[%s4784_s27 + $0x58] sm:$0xff] %vm1644_vm15, %v1720_v8  ;;  %v1719_v61 = vsel %vm5454_vm1, %v1548_v40, 0.0  ;;  %vm5484_vm1 = vcmp.lt.s32.totalorder %v5483_v63, 500 }
 0x3d9   : > { %1751 = vst.msk [vmem:[%s4784_s27 + $0x50] sm:$0xff] %vm1644_vm15, %v1719_v61 }
 0x3da   : > { %v1557_v41 = vpop.xlane.xlu1 %1556 }
 0x3db   : > { %v1722_v25 = vsel %vm5456_vm2, %v1557_v41, 0.0  ;;  %v1554_v3 = vpop.xlane.xlu0 %1553  ;;  %vm5486_vm2 = vcmp.lt.s32.totalorder %v5485_v46, 500 }
 0x3dc   : > { %1754 = vst.msk [vmem:[%s4784_s27 + $0x68] sm:$0xff] %vm1644_vm15, %v1722_v25  ;;  %v1721_v56 = vsel %vm5458_vm3, %v1554_v3, 0.0  ;;  %vm5488_vm3 = vcmp.lt.s32.totalorder %v5487_v5, 500 }
 0x3dd   : > { %1753 = vst.msk [vmem:[%s4784_s27 + $0x60] sm:$0xff] %vm1644_vm15, %v1721_v56 }
 0x3de   : > { %v1563_v20 = vpop.xlane.xlu1 %1562 }
 0x3df   : > { %v1724_v23 = vsel %vm5460_vm4, %v1563_v20, 0.0  ;;  %v1560_v49 = vpop.xlane.xlu0 %1559  ;;  %vm5490_vm4 = vcmp.lt.s32.totalorder %v5489_v51, 500 }
 0x3e0   : > { %1756 = vst.msk [vmem:[%s4784_s27 + $0x78] sm:$0xff] %vm1644_vm15, %v1724_v23  ;;  %v1723_v55 = vsel %vm5462_vm5, %v1560_v49, 0.0  ;;  %vm5492_vm5 = vcmp.lt.s32.totalorder %v5491_v10, 500 }
 0x3e1   : > { %1755 = vst.msk [vmem:[%s4784_s27 + $0x70] sm:$0xff] %vm1644_vm15, %v1723_v55 }
 0x3e2   : > { %v1569_v30 = vpop.xlane.xlu1 %1568 }
 0x3e3   : > { %v1726_v38 = vsel %vm5464_vm6, %v1569_v30, 0.0  ;;  %v1566_v53 = vpop.xlane.xlu0 %1565  ;;  %vm5494_vm6 = vcmp.lt.s32.totalorder %v5493_v48, 500 }
 0x3e4   : > { %1758 = vst.msk [vmem:[%s4784_s27 + $0x88] sm:$0xff] %vm1644_vm15, %v1726_v38  ;;  %v1725_v57 = vsel %vm5466_vm7, %v1566_v53, 0.0 }
 0x3e5   : > { %1757 = vst.msk [vmem:[%s4784_s27 + $0x80] sm:$0xff] %vm1644_vm15, %v1725_v57 }
 0x3e6   : > { %v1575_v17 = vpop.xlane.xlu1 %1574 }
 0x3e7   : > { %v1728_v43 = vsel %vm5468_vm8, %v1575_v17, 0.0  ;;  %v1572_v12 = vpop.xlane.xlu0 %1571 }
 0x3e8   : > { %1760 = vst.msk [vmem:[%s4784_s27 + $0x98] sm:$0xff] %vm1644_vm15, %v1728_v43  ;;  %v1727_v28 = vsel %vm5470_vm9, %v1572_v12, 0.0 }
 0x3e9   : > { %1759 = vst.msk [vmem:[%s4784_s27 + $0x90] sm:$0xff] %vm1644_vm15, %v1727_v28 }
 0x3ea   : > { %v1581_v59 = vpop.xlane.xlu1 %1580 }
 0x3eb   : > { %v1730_v19 = vsel %vm5472_vm10, %v1581_v59, 0.0  ;;  %v1578_v34 = vpop.xlane.xlu0 %1577 }
 0x3ec   : > { %1762 = vst.msk [vmem:[%s4784_s27 + $0xa8] sm:$0xff] %vm1644_vm15, %v1730_v19  ;;  %v1729_v36 = vsel %vm5474_vm13, %v1578_v34, 0.0 }
 0x3ed   : > { %1761 = vst.msk [vmem:[%s4784_s27 + $0xa0] sm:$0xff] %vm1644_vm15, %v1729_v36 }
 0x3ee   : > { %v1587_v27 = vpop.xlane.xlu1 %1586 }
 0x3ef   : > { %v1732_v24 = vsel %vm5476_vm14, %v1587_v27, 0.0  ;;  %v1584_v13 = vpop.xlane.xlu0 %1583 }
 0x3f0   : > { %1764 = vst.msk [vmem:[%s4784_s27 + $0xb8] sm:$0xff] %vm1644_vm15, %v1732_v24  ;;  %v1731_v32 = vsel %vm5478_vm12, %v1584_v13, 0.0 }
 0x3f1   : > { %1763 = vst.msk [vmem:[%s4784_s27 + $0xb0] sm:$0xff] %vm1644_vm15, %v1731_v32 }
 0x3f2   : > { %v1593_v44 = vpop.xlane.xlu1 %1592 }
 0x3f3   : > { %v1734_v39 = vsel %vm5480_vm11, %v1593_v44, 0.0  ;;  %v1590_v29 = vpop.xlane.xlu0 %1589 }
 0x3f4   : > { %1766 = vst.msk [vmem:[%s4784_s27 + $0xc8] sm:$0xff] %vm1644_vm15, %v1734_v39  ;;  %v1733_v62 = vsel %vm5482_vm0, %v1590_v29, 0.0 }
 0x3f5   : > { %1765 = vst.msk [vmem:[%s4784_s27 + $0xc0] sm:$0xff] %vm1644_vm15, %v1733_v62 }
 0x3f6   : > { %v1599_v22 = vpop.xlane.xlu1 %1598 }
 0x3f7   : > { %v1736_v60 = vsel %vm5484_vm1, %v1599_v22, 0.0  ;;  %v1596_v21 = vpop.xlane.xlu0 %1595 }
 0x3f8   : > { %1768 = vst.msk [vmem:[%s4784_s27 + $0xd8] sm:$0xff] %vm1644_vm15, %v1736_v60  ;;  %v1735_v45 = vsel %vm5486_vm2, %v1596_v21, 0.0 }
 0x3f9   : > { %1767 = vst.msk [vmem:[%s4784_s27 + $0xd0] sm:$0xff] %vm1644_vm15, %v1735_v45 }
 0x3fa   : > { %v1605_v14 = vpop.xlane.xlu1 %1604 }
 0x3fb   : > { %v1738_v31 = vsel %vm5488_vm3, %v1605_v14, 0.0  ;;  %v1602_v37 = vpop.xlane.xlu0 %1601  ;;  %1787 = sbr.rel (!%p3738_p4) target bundleno = 1082 (0x43a), region = 40 }
 0x3fc   : > { %1770 = vst.msk [vmem:[%s4784_s27 + $0xe8] sm:$0xff] %vm1644_vm15, %v1738_v31  ;;  %v1737_v16 = vsel %vm5490_vm4, %v1602_v37, 0.0 }
 0x3fd   : > { %1769 = vst.msk [vmem:[%s4784_s27 + $0xe0] sm:$0xff] %vm1644_vm15, %v1737_v16 }
 0x3fe   : > { %v1611_v4 = vpop.xlane.xlu1 %1610 }
 0x3ff   : > { %v1740_v6 = vsel %vm5492_vm5, %v1611_v4, 0.0  ;;  %v1608_v42 = vpop.xlane.xlu0 %1607 }
 0x400   : > { %1772 = vst.msk [vmem:[%s4784_s27 + $0xf8] sm:$0xff] %vm1644_vm15, %v1740_v6  ;;  %v1739_v2 = vsel %vm5494_vm6, %v1608_v42, 0.0 }
 0x401   : > { %1771 = vst.msk [vmem:[%s4784_s27 + $0xf0] sm:$0xff] %vm1644_vm15, %v1739_v2 }
 0x402   : > { %s5514_s30 = smov (!%p1790_p8, %s1789_s30), 32 }
 0x403   : > { %s2855_s10 = sshll.u32 %s5514_s30, 7 }
 0x404   : > { %p2858_p9 = scmp.eq.s32.totalorder %s2855_s10, 0 }
 0x405   : > { %s4925_s11 = sshrl.u32 (!%p2858_p9), %s5514_s30, 5 }
 0x406   : > { %1798 = sbr.rel (%p2858_p9) target bundleno = 1082 (0x43a), region = 44  ;;  %p2859_p10 = scmp.le.s32.totalorder (!%p2858_p9), %s4925_s11, 0 }
 0x40d   : > { %2626 = sbr.rel (%p2859_p10) target bundleno = 1061 (0x425), region = 264  ;;  %s5495_s14 = smov (!%p2859_p10), %s4919_s9 }
 0x40e   : > { %s5496_s15 = smov (!%p2859_p10), %s4416_s26  ;;  %s4934_s16 = smov (!%p2859_p10), 0  }
 0x40f   : > { %s4936_s17 = smov (!%p2859_p10), 0  }
 0x414 LB: >> { %v1922_v8 = vld [vmem:[%s3590_s15] sm:$0xff]  ;;  %v1924_v40 = vld [vmem:[%s3590_s15 + $0x8] sm:$0xff]  ;;  %v1926_v9 = vld [vmem:[%s3590_s15 + $0x10] sm:$0xff]  ;;  %s1986_s18 = sadd.s32 1, %s3594_s16  ;;  %s1916_s17 = sadd.s32 1, %s3598_s17   ;;  %s3598_s17 = sphi %s4936_s17, %s1916_s17   ;;  %s3594_s16 = sphi %s4934_s16, %s5499_s16   ;;  %s3590_s15 = sphi %s5496_s15, %s5498_s15   ;;  %s3586_s14 = sphi %s5495_s14, %s5497_s14  }
 0x415   : >> { %1923 = vst [vmem:[%s3586_s14] sm:$0xff] %v1922_v8  ;;  %1925 = vst [vmem:[%s3586_s14 + $0x8] sm:$0xff] %v1924_v40  ;;  %v1928_v61 = vld [vmem:[%s3590_s15 + $0x18] sm:$0xff]  ;;  %v1930_v41 = vld [vmem:[%s3590_s15 + $0x20] sm:$0xff]  ;;  %p1987_p11 = scmp.ge.s32.totalorder %s1986_s18, %s4925_s11  ;;  %p1915_p12 = scmp.ge.s32.totalorder %s1916_s17, %s4925_s11 }
 0x416   : >> { %1927 = vst [vmem:[%s3586_s14 + $0x10] sm:$0xff] %v1926_v9  ;;  %v1932_v33 = vld [vmem:[%s3590_s15 + $0x28] sm:$0xff]  ;;  %1929 = vst [vmem:[%s3586_s14 + $0x18] sm:$0xff] %v1928_v61  ;;  %v1934_v25 = vld [vmem:[%s3590_s15 + $0x30] sm:$0xff] }
 0x417   : >> { %1931 = vst [vmem:[%s3586_s14 + $0x20] sm:$0xff] %v1930_v41  ;;  %1933 = vst [vmem:[%s3586_s14 + $0x28] sm:$0xff] %v1932_v33  ;;  %v1936_v3 = vld [vmem:[%s3590_s15 + $0x38] sm:$0xff]  ;;  %v1938_v47 = vld [vmem:[%s3590_s15 + $0x40] sm:$0xff]  ;;  %s5516_s18 = smov (%p1987_p11, %s1986_s18), 0 }
 0x418   : >> { %1935 = vst [vmem:[%s3586_s14 + $0x30] sm:$0xff] %v1934_v25  ;;  %1937 = vst [vmem:[%s3586_s14 + $0x38] sm:$0xff] %v1936_v3  ;;  %v1940_v56 = vld [vmem:[%s3590_s15 + $0x48] sm:$0xff]  ;;  %v1942_v20 = vld [vmem:[%s3590_s15 + $0x50] sm:$0xff]  ;;  %s2860_s19 = sshll.u32 %s5516_s18, 8  ;;  %s5499_s16 = smov %s5516_s18 }
 0x419   : >> { %1939 = vst [vmem:[%s3586_s14 + $0x40] sm:$0xff] %v1938_v47  ;;  %v1944_v7 = vld [vmem:[%s3590_s15 + $0x58] sm:$0xff]  ;;  %1941 = vst [vmem:[%s3586_s14 + $0x48] sm:$0xff] %v1940_v56  ;;  %v1946_v23 = vld [vmem:[%s3590_s15 + $0x60] sm:$0xff]  ;;  %s4992_s20 = scalar_lea.vmem %s4416_s26, %s2860_s19 [#allocation2]   ;;  %s1992_s23 = scalar_lea.vmem %s4919_s9, %s2860_s19  }
 0x41a   : >> { %1943 = vst [vmem:[%s3586_s14 + $0x50] sm:$0xff] %v1942_v20  ;;  %1945 = vst [vmem:[%s3586_s14 + $0x58] sm:$0xff] %v1944_v7  ;;  %v1948_v49 = vld [vmem:[%s3590_s15 + $0x68] sm:$0xff]  ;;  %v1950_v15 = vld [vmem:[%s3590_s15 + $0x70] sm:$0xff] }
 0x41b   : >> { %1947 = vst [vmem:[%s3586_s14 + $0x60] sm:$0xff] %v1946_v23  ;;  %1949 = vst [vmem:[%s3586_s14 + $0x68] sm:$0xff] %v1948_v49  ;;  %v1952_v55 = vld [vmem:[%s3590_s15 + $0x78] sm:$0xff]  ;;  %v1954_v30 = vld [vmem:[%s3590_s15 + $0x80] sm:$0xff] }
 0x41c   : >> { %1951 = vst [vmem:[%s3586_s14 + $0x70] sm:$0xff] %v1950_v15  ;;  %v1956_v0 = vld [vmem:[%s3590_s15 + $0x88] sm:$0xff]  ;;  %1953 = vst [vmem:[%s3586_s14 + $0x78] sm:$0xff] %v1952_v55  ;;  %v1958_v38 = vld [vmem:[%s3590_s15 + $0x90] sm:$0xff] }
 0x41d   : >> { %1955 = vst [vmem:[%s3586_s14 + $0x80] sm:$0xff] %v1954_v30  ;;  %1957 = vst [vmem:[%s3586_s14 + $0x88] sm:$0xff] %v1956_v0  ;;  %v1960_v53 = vld [vmem:[%s3590_s15 + $0x98] sm:$0xff]  ;;  %v1962_v18 = vld [vmem:[%s3590_s15 + $0xa0] sm:$0xff] }
 0x41e   : >> { %1959 = vst [vmem:[%s3586_s14 + $0x90] sm:$0xff] %v1958_v38  ;;  %1961 = vst [vmem:[%s3586_s14 + $0x98] sm:$0xff] %v1960_v53  ;;  %v1964_v57 = vld [vmem:[%s3590_s15 + $0xa8] sm:$0xff]  ;;  %v1966_v17 = vld [vmem:[%s3590_s15 + $0xb0] sm:$0xff]  ;;  %1918 = sbr.rel (!%p1915_p12) target bundleno = 1044 (0x414), region = 270 }
 0x41f   : >> { %1963 = vst [vmem:[%s3586_s14 + $0xa0] sm:$0xff] %v1962_v18  ;;  %v1968_v35 = vld [vmem:[%s3590_s15 + $0xb8] sm:$0xff]  ;;  %1965 = vst [vmem:[%s3586_s14 + $0xa8] sm:$0xff] %v1964_v57  ;;  %v1970_v43 = vld [vmem:[%s3590_s15 + $0xc0] sm:$0xff] }
 0x420   : >> { %1967 = vst [vmem:[%s3586_s14 + $0xb0] sm:$0xff] %v1966_v17  ;;  %1969 = vst [vmem:[%s3586_s14 + $0xb8] sm:$0xff] %v1968_v35  ;;  %v1972_v12 = vld [vmem:[%s3590_s15 + $0xc8] sm:$0xff]  ;;  %v1974_v52 = vld [vmem:[%s3590_s15 + $0xd0] sm:$0xff] }
 0x421   : >> { %1971 = vst [vmem:[%s3586_s14 + $0xc0] sm:$0xff] %v1970_v43  ;;  %1973 = vst [vmem:[%s3586_s14 + $0xc8] sm:$0xff] %v1972_v12  ;;  %v1976_v28 = vld [vmem:[%s3590_s15 + $0xd8] sm:$0xff]  ;;  %v1978_v59 = vld [vmem:[%s3590_s15 + $0xe0] sm:$0xff] }
 0x422   : >> { %1975 = vst [vmem:[%s3586_s14 + $0xd0] sm:$0xff] %v1974_v52  ;;  %v1980_v1 = vld [vmem:[%s3590_s15 + $0xe8] sm:$0xff]  ;;  %1977 = vst [vmem:[%s3586_s14 + $0xd8] sm:$0xff] %v1976_v28  ;;  %v1982_v19 = vld [vmem:[%s3590_s15 + $0xf0] sm:$0xff] }
 0x423   : >> { %1979 = vst [vmem:[%s3586_s14 + $0xe0] sm:$0xff] %v1978_v59  ;;  %1981 = vst [vmem:[%s3586_s14 + $0xe8] sm:$0xff] %v1980_v1  ;;  %v1984_v34 = vld [vmem:[%s3590_s15 + $0xf8] sm:$0xff]  ;;  %s5498_s15 = smov %s4992_s20 }
 0x424   : >> { %1983 = vst [vmem:[%s3586_s14 + $0xf0] sm:$0xff] %v1982_v19  ;;  %1985 = vst [vmem:[%s3586_s14 + $0xf8] sm:$0xff] %v1984_v34  ;;  %s5497_s14 = smov %s1992_s23 }
 0x425 PF: > { %s5033_s24 = sand.u32 31, %s5514_s30   ;;  %s2899_s7 = sshll.u32 %s4925_s11, 8 }
 0x426   : > { %s1997_s8 = scalar_lea.vmem %s4416_s26, %s2899_s7 [#allocation2]   ;;  %s1999_s10 = scalar_lea.vmem %s4919_s9, %s2899_s7  }
 0x427   : > { %p2865_p13 = scmp.le.s32.totalorder %s5033_s24, 0 }
 0x428   : > { %s3600_s19 = smov (!%p2865_p13), %s1999_s10   ;;  %s3604_s20 = smov (!%p2865_p13), %s1997_s8  }
 0x429   : > { %2640 = sbr.rel (%p2865_p13) target bundleno = 1082 (0x43a), region = 275  ;;  %s3608_s23 = smov (!%p2865_p13), 0  }
 0x42a   : > { %s3612_s18 = smov (!%p2865_p13), 0  }
 0x430 LB: >> { %v2009_v26 = vld [vmem:[%s3606_s20] sm:$0xff]  ;;  %s2011_s30 = sadd.s32 1, %s3610_s23  ;;  %s2003_s18 = sadd.s32 1, %s3614_s18   ;;  %s3614_s18 = sphi %s3612_s18, %s2003_s18   ;;  %s3610_s23 = sphi %s3608_s23, %s3609_s23   ;;  %s3606_s20 = sphi %s3604_s20, %s2016_s20   ;;  %s3602_s19 = sphi %s3600_s19, %s2017_s19  }
 0x431   : >> { %2010 = vst [vmem:[%s3602_s19] sm:$0xff] %v2009_v26  ;;  %p2012_p0 = scmp.ge.s32.totalorder %s2011_s30, %s5033_s24  ;;  %p2002_p1 = scmp.ge.s32.totalorder %s2003_s18, %s5033_s24 }
 0x433   : >> { %s5518_s30 = smov (%p2012_p0, %s2011_s30), 0  ;;  %2005 = sbr.rel (!%p2002_p1) target bundleno = 1072 (0x430), region = 281 }
 0x434   : >> { %s2866_s26 = sshll.u32 %s5518_s30, 3  ;;  %s3609_s23 = smov %s5518_s30  }
 0x435   : >> { %s2016_s20 = scalar_lea.vmem %s1997_s8, %s2866_s26 [#allocation2]   ;;  %s2017_s19 = scalar_lea.vmem %s1999_s10, %s2866_s26  }
 0x43a PF: > { %2023 = sbr.rel (!%p3738_p4) target bundleno = 1145 (0x479), region = 92  ;;  %s2025_s9 = ssub.s32 (%p3738_p4), 63, %s3751_s12 }
 0x43b   : > { %s5048_s15 = scalar_lea.vmem (%p3738_p4), %s5314_s5, %s3753_s13   ;;  %p2026_p2 = scmp.lt.s32.totalorder (%p3738_p4), %s2025_s9, 32 }
 0x441   : > { %s5520_s9 = smov (!%p2026_p2, %s2025_s9), 32 }
 0x442   : > { %s2869_s16 = sshll.u32 %s5520_s9, 7 }
 0x443   : > { %p2872_p3 = scmp.eq.s32.totalorder %s2869_s16, 0 }
 0x444   : > { %s5054_s17 = sshrl.u32 (!%p2872_p3), %s5520_s9, 5 }
 0x445   : > { %2034 = sbr.rel (%p2872_p3) target bundleno = 1145 (0x479), region = 96  ;;  %p2873_p5 = scmp.le.s32.totalorder (!%p2872_p3), %s5054_s17, 0 }
 0x44c   : > { %2654 = sbr.rel (%p2873_p5) target bundleno = 1124 (0x464), region = 286  ;;  %s5500_s24 = smov (!%p2873_p5), %s5048_s15 }
 0x44d   : > { %s5501_s7 = smov (!%p2873_p5), %s4548_s21  ;;  %s5063_s8 = smov (!%p2873_p5), 0  }
 0x44e   : > { %s5065_s10 = smov (!%p2873_p5), 0  }
 0x453 LB: >> { %v2158_v36 = vld [vmem:[%s3622_s7] sm:$0xff]  ;;  %v2160_v27 = vld [vmem:[%s3622_s7 + $0x8] sm:$0xff]  ;;  %v2162_v50 = vld [vmem:[%s3622_s7 + $0x10] sm:$0xff]  ;;  %s2222_s19 = sadd.s32 1, %s3626_s8  ;;  %s2152_s10 = sadd.s32 1, %s3630_s10   ;;  %s3630_s10 = sphi %s5065_s10, %s2152_s10   ;;  %s3626_s8 = sphi %s5063_s8, %s5504_s8   ;;  %s3622_s7 = sphi %s5501_s7, %s5503_s7   ;;  %s3618_s24 = sphi %s5500_s24, %s5502_s24  }
 0x454   : >> { %2159 = vst [vmem:[%s3618_s24] sm:$0xff] %v2158_v36  ;;  %2161 = vst [vmem:[%s3618_s24 + $0x8] sm:$0xff] %v2160_v27  ;;  %v2164_v24 = vld [vmem:[%s3622_s7 + $0x18] sm:$0xff]  ;;  %v2166_v13 = vld [vmem:[%s3622_s7 + $0x20] sm:$0xff]  ;;  %p2223_p6 = scmp.ge.s32.totalorder %s2222_s19, %s5054_s17  ;;  %p2151_p7 = scmp.ge.s32.totalorder %s2152_s10, %s5054_s17 }
 0x455   : >> { %2163 = vst [vmem:[%s3618_s24 + $0x10] sm:$0xff] %v2162_v50  ;;  %v2168_v54 = vld [vmem:[%s3622_s7 + $0x28] sm:$0xff]  ;;  %2165 = vst [vmem:[%s3618_s24 + $0x18] sm:$0xff] %v2164_v24  ;;  %v2170_v32 = vld [vmem:[%s3622_s7 + $0x30] sm:$0xff] }
 0x456   : >> { %2167 = vst [vmem:[%s3618_s24 + $0x20] sm:$0xff] %v2166_v13  ;;  %2169 = vst [vmem:[%s3618_s24 + $0x28] sm:$0xff] %v2168_v54  ;;  %v2172_v44 = vld [vmem:[%s3622_s7 + $0x38] sm:$0xff]  ;;  %v2174_v58 = vld [vmem:[%s3622_s7 + $0x40] sm:$0xff]  ;;  %s5522_s19 = smov (%p2223_p6, %s2222_s19), 0 }
 0x457   : >> { %2171 = vst [vmem:[%s3618_s24 + $0x30] sm:$0xff] %v2170_v32  ;;  %2173 = vst [vmem:[%s3618_s24 + $0x38] sm:$0xff] %v2172_v44  ;;  %v2176_v39 = vld [vmem:[%s3622_s7 + $0x48] sm:$0xff]  ;;  %v2178_v29 = vld [vmem:[%s3622_s7 + $0x50] sm:$0xff]  ;;  %s2874_s20 = sshll.u32 %s5522_s19, 8  ;;  %s5504_s8 = smov %s5522_s19 }
 0x458   : >> { %2175 = vst [vmem:[%s3618_s24 + $0x40] sm:$0xff] %v2174_v58  ;;  %v2180_v11 = vld [vmem:[%s3622_s7 + $0x58] sm:$0xff]  ;;  %2177 = vst [vmem:[%s3618_s24 + $0x48] sm:$0xff] %v2176_v39  ;;  %v2182_v62 = vld [vmem:[%s3622_s7 + $0x60] sm:$0xff]  ;;  %s5121_s23 = scalar_lea.vmem %s4548_s21, %s2874_s20 [#allocation3]   ;;  %s2228_s18 = scalar_lea.vmem %s5048_s15, %s2874_s20  }
 0x459   : >> { %2179 = vst [vmem:[%s3618_s24 + $0x50] sm:$0xff] %v2178_v29  ;;  %2181 = vst [vmem:[%s3618_s24 + $0x58] sm:$0xff] %v2180_v11  ;;  %v2184_v22 = vld [vmem:[%s3622_s7 + $0x68] sm:$0xff]  ;;  %v2186_v63 = vld [vmem:[%s3622_s7 + $0x70] sm:$0xff] }
 0x45a   : >> { %2183 = vst [vmem:[%s3618_s24 + $0x60] sm:$0xff] %v2182_v62  ;;  %2185 = vst [vmem:[%s3618_s24 + $0x68] sm:$0xff] %v2184_v22  ;;  %v2188_v60 = vld [vmem:[%s3622_s7 + $0x78] sm:$0xff]  ;;  %v2190_v21 = vld [vmem:[%s3622_s7 + $0x80] sm:$0xff] }
 0x45b   : >> { %2187 = vst [vmem:[%s3618_s24 + $0x70] sm:$0xff] %v2186_v63  ;;  %v2192_v46 = vld [vmem:[%s3622_s7 + $0x88] sm:$0xff]  ;;  %2189 = vst [vmem:[%s3618_s24 + $0x78] sm:$0xff] %v2188_v60  ;;  %v2194_v45 = vld [vmem:[%s3622_s7 + $0x90] sm:$0xff] }
 0x45c   : >> { %2191 = vst [vmem:[%s3618_s24 + $0x80] sm:$0xff] %v2190_v21  ;;  %2193 = vst [vmem:[%s3618_s24 + $0x88] sm:$0xff] %v2192_v46  ;;  %v2196_v14 = vld [vmem:[%s3622_s7 + $0x98] sm:$0xff]  ;;  %v2198_v5 = vld [vmem:[%s3622_s7 + $0xa0] sm:$0xff] }
 0x45d   : >> { %2195 = vst [vmem:[%s3618_s24 + $0x90] sm:$0xff] %v2194_v45  ;;  %2197 = vst [vmem:[%s3618_s24 + $0x98] sm:$0xff] %v2196_v14  ;;  %v2200_v31 = vld [vmem:[%s3622_s7 + $0xa8] sm:$0xff]  ;;  %v2202_v37 = vld [vmem:[%s3622_s7 + $0xb0] sm:$0xff]  ;;  %2154 = sbr.rel (!%p2151_p7) target bundleno = 1107 (0x453), region = 292 }
 0x45e   : >> { %2199 = vst [vmem:[%s3618_s24 + $0xa0] sm:$0xff] %v2198_v5  ;;  %v2204_v51 = vld [vmem:[%s3622_s7 + $0xb8] sm:$0xff]  ;;  %2201 = vst [vmem:[%s3618_s24 + $0xa8] sm:$0xff] %v2200_v31  ;;  %v2206_v16 = vld [vmem:[%s3622_s7 + $0xc0] sm:$0xff] }
 0x45f   : >> { %2203 = vst [vmem:[%s3618_s24 + $0xb0] sm:$0xff] %v2202_v37  ;;  %2205 = vst [vmem:[%s3618_s24 + $0xb8] sm:$0xff] %v2204_v51  ;;  %v2208_v4 = vld [vmem:[%s3622_s7 + $0xc8] sm:$0xff]  ;;  %v2210_v10 = vld [vmem:[%s3622_s7 + $0xd0] sm:$0xff] }
 0x460   : >> { %2207 = vst [vmem:[%s3618_s24 + $0xc0] sm:$0xff] %v2206_v16  ;;  %2209 = vst [vmem:[%s3618_s24 + $0xc8] sm:$0xff] %v2208_v4  ;;  %v2212_v6 = vld [vmem:[%s3622_s7 + $0xd8] sm:$0xff]  ;;  %v2214_v42 = vld [vmem:[%s3622_s7 + $0xe0] sm:$0xff] }
 0x461   : >> { %2211 = vst [vmem:[%s3618_s24 + $0xd0] sm:$0xff] %v2210_v10  ;;  %v2216_v48 = vld [vmem:[%s3622_s7 + $0xe8] sm:$0xff]  ;;  %2213 = vst [vmem:[%s3618_s24 + $0xd8] sm:$0xff] %v2212_v6  ;;  %v2218_v2 = vld [vmem:[%s3622_s7 + $0xf0] sm:$0xff] }
 0x462   : >> { %2215 = vst [vmem:[%s3618_s24 + $0xe0] sm:$0xff] %v2214_v42  ;;  %2217 = vst [vmem:[%s3618_s24 + $0xe8] sm:$0xff] %v2216_v48  ;;  %v2220_v8 = vld [vmem:[%s3622_s7 + $0xf8] sm:$0xff]  ;;  %s5503_s7 = smov %s5121_s23 }
 0x463   : >> { %2219 = vst [vmem:[%s3618_s24 + $0xf0] sm:$0xff] %v2218_v2  ;;  %2221 = vst [vmem:[%s3618_s24 + $0xf8] sm:$0xff] %v2220_v8  ;;  %s5502_s24 = smov %s2228_s18 }
 0x464 PF: > { %s5162_s30 = sand.u32 31, %s5520_s9   ;;  %s2902_s26 = sshll.u32 %s5054_s17, 8 }
 0x465   : > { %s2233_s11 = scalar_lea.vmem %s4548_s21, %s2902_s26 [#allocation3]   ;;  %s2235_s14 = scalar_lea.vmem %s5048_s15, %s2902_s26  }
 0x466   : > { %p2879_p8 = scmp.le.s32.totalorder %s5162_s30, 0 }
 0x467   : > { %s3632_s16 = smov (!%p2879_p8), %s2235_s14   ;;  %s3636_s20 = smov (!%p2879_p8), %s2233_s11  }
 0x468   : > { %2668 = sbr.rel (%p2879_p8) target bundleno = 1145 (0x479), region = 297  ;;  %s3640_s23 = smov (!%p2879_p8), 0  }
 0x469   : > { %s3644_s19 = smov (!%p2879_p8), 0  }
 0x46f LB: >> { %v2245_v40 = vld [vmem:[%s3638_s20] sm:$0xff]  ;;  %s2247_s9 = sadd.s32 1, %s3642_s23  ;;  %s2239_s19 = sadd.s32 1, %s3646_s19   ;;  %s3646_s19 = sphi %s3644_s19, %s2239_s19   ;;  %s3642_s23 = sphi %s3640_s23, %s3641_s23   ;;  %s3638_s20 = sphi %s3636_s20, %s2252_s20   ;;  %s3634_s16 = sphi %s3632_s16, %s2253_s16  }
 0x470   : >> { %2246 = vst [vmem:[%s3634_s16] sm:$0xff] %v2245_v40  ;;  %p2248_p9 = scmp.ge.s32.totalorder %s2247_s9, %s5162_s30  ;;  %p2238_p10 = scmp.ge.s32.totalorder %s2239_s19, %s5162_s30 }
 0x472   : >> { %s5524_s9 = smov (%p2248_p9, %s2247_s9), 0  ;;  %2241 = sbr.rel (!%p2238_p10) target bundleno = 1135 (0x46f), region = 303 }
 0x473   : >> { %s2880_s21 = sshll.u32 %s5524_s9, 3  ;;  %s3641_s23 = smov %s5524_s9  }
 0x474   : >> { %s2252_s20 = scalar_lea.vmem %s2233_s11, %s2880_s21 [#allocation3]   ;;  %s2253_s16 = scalar_lea.vmem %s2235_s14, %s2880_s21  }
 0x479 PF: > { %2259 = sbr.rel (!%p3738_p4) target bundleno = 1208 (0x4b8), region = 144  ;;  %s2261_s15 = ssub.s32 (%p3738_p4), 63, %s3751_s12 }
 0x47a   : > { %s5177_s7 = scalar_lea.vmem (%p3738_p4), %s5315_s6, %s3753_s13   ;;  %p2262_p11 = scmp.lt.s32.totalorder (%p3738_p4), %s2261_s15, 32 }
 0x480   : > { %s5526_s15 = smov (!%p2262_p11, %s2261_s15), 32 }
 0x481   : > { %s2883_s8 = sshll.u32 %s5526_s15, 7 }
 0x482   : > { %p2886_p12 = scmp.eq.s32.totalorder %s2883_s8, 0 }
 0x483   : > { %s5183_s10 = sshrl.u32 (!%p2886_p12), %s5526_s15, 5 }
 0x484   : > { %2270 = sbr.rel (%p2886_p12) target bundleno = 1208 (0x4b8), region = 148  ;;  %p2887_p4 = scmp.le.s32.totalorder (!%p2886_p12), %s5183_s10, 0 }
 0x48b   : > { %2682 = sbr.rel (%p2887_p4) target bundleno = 1187 (0x4a3), region = 308  ;;  %s5505_s29 = smov (!%p2887_p4), %s5177_s7 }
 0x48c   : > { %s5506_s12 = smov (!%p2887_p4), %s4784_s27  ;;  %s5192_s13 = smov (!%p2887_p4), 0  }
 0x48d   : > { %s5194_s18 = smov (!%p2887_p4), 0  }
 0x492 LB: >> { %v2394_v9 = vld [vmem:[%s3654_s12] sm:$0xff]  ;;  %v2396_v61 = vld [vmem:[%s3654_s12 + $0x8] sm:$0xff]  ;;  %v2398_v41 = vld [vmem:[%s3654_s12 + $0x10] sm:$0xff]  ;;  %s2458_s30 = sadd.s32 1, %s3658_s13  ;;  %s2388_s18 = sadd.s32 1, %s3662_s18   ;;  %s3662_s18 = sphi %s5194_s18, %s2388_s18   ;;  %s3658_s13 = sphi %s5192_s13, %s5509_s13   ;;  %s3654_s12 = sphi %s5506_s12, %s5508_s12   ;;  %s3650_s29 = sphi %s5505_s29, %s5507_s29  }
 0x493   : >> { %2395 = vst [vmem:[%s3650_s29] sm:$0xff] %v2394_v9  ;;  %2397 = vst [vmem:[%s3650_s29 + $0x8] sm:$0xff] %v2396_v61  ;;  %v2400_v33 = vld [vmem:[%s3654_s12 + $0x18] sm:$0xff]  ;;  %v2402_v25 = vld [vmem:[%s3654_s12 + $0x20] sm:$0xff]  ;;  %p2459_p13 = scmp.ge.s32.totalorder %s2458_s30, %s5183_s10  ;;  %p2387_p0 = scmp.ge.s32.totalorder %s2388_s18, %s5183_s10 }
 0x494   : >> { %2399 = vst [vmem:[%s3650_s29 + $0x10] sm:$0xff] %v2398_v41  ;;  %v2404_v3 = vld [vmem:[%s3654_s12 + $0x28] sm:$0xff]  ;;  %2401 = vst [vmem:[%s3650_s29 + $0x18] sm:$0xff] %v2400_v33  ;;  %v2406_v47 = vld [vmem:[%s3654_s12 + $0x30] sm:$0xff] }
 0x495   : >> { %2403 = vst [vmem:[%s3650_s29 + $0x20] sm:$0xff] %v2402_v25  ;;  %2405 = vst [vmem:[%s3650_s29 + $0x28] sm:$0xff] %v2404_v3  ;;  %v2408_v56 = vld [vmem:[%s3654_s12 + $0x38] sm:$0xff]  ;;  %v2410_v20 = vld [vmem:[%s3654_s12 + $0x40] sm:$0xff]  ;;  %s5528_s30 = smov (%p2459_p13, %s2458_s30), 0 }
 0x496   : >> { %2407 = vst [vmem:[%s3650_s29 + $0x30] sm:$0xff] %v2406_v47  ;;  %2409 = vst [vmem:[%s3650_s29 + $0x38] sm:$0xff] %v2408_v56  ;;  %v2412_v7 = vld [vmem:[%s3654_s12 + $0x48] sm:$0xff]  ;;  %v2414_v23 = vld [vmem:[%s3654_s12 + $0x50] sm:$0xff]  ;;  %s2888_s26 = sshll.u32 %s5528_s30, 8  ;;  %s5509_s13 = smov %s5528_s30 }
 0x497   : >> { %2411 = vst [vmem:[%s3650_s29 + $0x40] sm:$0xff] %v2410_v20  ;;  %v2416_v49 = vld [vmem:[%s3654_s12 + $0x58] sm:$0xff]  ;;  %2413 = vst [vmem:[%s3650_s29 + $0x48] sm:$0xff] %v2412_v7  ;;  %v2418_v15 = vld [vmem:[%s3654_s12 + $0x60] sm:$0xff]  ;;  %s5250_s11 = scalar_lea.vmem %s4784_s27, %s2888_s26 [#allocation4]   ;;  %s2464_s14 = scalar_lea.vmem %s5177_s7, %s2888_s26  }
 0x498   : >> { %2415 = vst [vmem:[%s3650_s29 + $0x50] sm:$0xff] %v2414_v23  ;;  %2417 = vst [vmem:[%s3650_s29 + $0x58] sm:$0xff] %v2416_v49  ;;  %v2420_v55 = vld [vmem:[%s3654_s12 + $0x68] sm:$0xff]  ;;  %v2422_v30 = vld [vmem:[%s3654_s12 + $0x70] sm:$0xff] }
 0x499   : >> { %2419 = vst [vmem:[%s3650_s29 + $0x60] sm:$0xff] %v2418_v15  ;;  %2421 = vst [vmem:[%s3650_s29 + $0x68] sm:$0xff] %v2420_v55  ;;  %v2424_v0 = vld [vmem:[%s3654_s12 + $0x78] sm:$0xff]  ;;  %v2426_v38 = vld [vmem:[%s3654_s12 + $0x80] sm:$0xff] }
 0x49a   : >> { %2423 = vst [vmem:[%s3650_s29 + $0x70] sm:$0xff] %v2422_v30  ;;  %v2428_v53 = vld [vmem:[%s3654_s12 + $0x88] sm:$0xff]  ;;  %2425 = vst [vmem:[%s3650_s29 + $0x78] sm:$0xff] %v2424_v0  ;;  %v2430_v18 = vld [vmem:[%s3654_s12 + $0x90] sm:$0xff] }
 0x49b   : >> { %2427 = vst [vmem:[%s3650_s29 + $0x80] sm:$0xff] %v2426_v38  ;;  %2429 = vst [vmem:[%s3650_s29 + $0x88] sm:$0xff] %v2428_v53  ;;  %v2432_v57 = vld [vmem:[%s3654_s12 + $0x98] sm:$0xff]  ;;  %v2434_v17 = vld [vmem:[%s3654_s12 + $0xa0] sm:$0xff] }
 0x49c   : >> { %2431 = vst [vmem:[%s3650_s29 + $0x90] sm:$0xff] %v2430_v18  ;;  %2433 = vst [vmem:[%s3650_s29 + $0x98] sm:$0xff] %v2432_v57  ;;  %v2436_v35 = vld [vmem:[%s3654_s12 + $0xa8] sm:$0xff]  ;;  %v2438_v43 = vld [vmem:[%s3654_s12 + $0xb0] sm:$0xff]  ;;  %2390 = sbr.rel (!%p2387_p0) target bundleno = 1170 (0x492), region = 314 }
 0x49d   : >> { %2435 = vst [vmem:[%s3650_s29 + $0xa0] sm:$0xff] %v2434_v17  ;;  %v2440_v12 = vld [vmem:[%s3654_s12 + $0xb8] sm:$0xff]  ;;  %2437 = vst [vmem:[%s3650_s29 + $0xa8] sm:$0xff] %v2436_v35  ;;  %v2442_v52 = vld [vmem:[%s3654_s12 + $0xc0] sm:$0xff] }
 0x49e   : >> { %2439 = vst [vmem:[%s3650_s29 + $0xb0] sm:$0xff] %v2438_v43  ;;  %2441 = vst [vmem:[%s3650_s29 + $0xb8] sm:$0xff] %v2440_v12  ;;  %v2444_v28 = vld [vmem:[%s3654_s12 + $0xc8] sm:$0xff]  ;;  %v2446_v59 = vld [vmem:[%s3654_s12 + $0xd0] sm:$0xff] }
 0x49f   : >> { %2443 = vst [vmem:[%s3650_s29 + $0xc0] sm:$0xff] %v2442_v52  ;;  %2445 = vst [vmem:[%s3650_s29 + $0xc8] sm:$0xff] %v2444_v28  ;;  %v2448_v1 = vld [vmem:[%s3654_s12 + $0xd8] sm:$0xff]  ;;  %v2450_v19 = vld [vmem:[%s3654_s12 + $0xe0] sm:$0xff] }
 0x4a0   : >> { %2447 = vst [vmem:[%s3650_s29 + $0xd0] sm:$0xff] %v2446_v59  ;;  %v2452_v34 = vld [vmem:[%s3654_s12 + $0xe8] sm:$0xff]  ;;  %2449 = vst [vmem:[%s3650_s29 + $0xd8] sm:$0xff] %v2448_v1  ;;  %v2454_v26 = vld [vmem:[%s3654_s12 + $0xf0] sm:$0xff] }
 0x4a1   : >> { %2451 = vst [vmem:[%s3650_s29 + $0xe0] sm:$0xff] %v2450_v19  ;;  %2453 = vst [vmem:[%s3650_s29 + $0xe8] sm:$0xff] %v2452_v34  ;;  %v2456_v36 = vld [vmem:[%s3654_s12 + $0xf8] sm:$0xff]  ;;  %s5508_s12 = smov %s5250_s11 }
 0x4a2   : >> { %2455 = vst [vmem:[%s3650_s29 + $0xf0] sm:$0xff] %v2454_v26  ;;  %2457 = vst [vmem:[%s3650_s29 + $0xf8] sm:$0xff] %v2456_v36  ;;  %s5507_s29 = smov %s2464_s14 }
 0x4a3 PF: > { %s5291_s16 = sand.u32 31, %s5526_s15   ;;  %s2905_s20 = sshll.u32 %s5183_s10, 8 }
 0x4a4   : > { %s2469_s23 = scalar_lea.vmem %s4784_s27, %s2905_s20 [#allocation4]   ;;  %s2471_s19 = scalar_lea.vmem %s5177_s7, %s2905_s20  }
 0x4a5   : > { %p2893_p1 = scmp.le.s32.totalorder %s5291_s16, 0 }
 0x4a6   : > { %s3664_s9 = smov (!%p2893_p1), %s2471_s19   ;;  %s3668_s21 = smov (!%p2893_p1), %s2469_s23  }
 0x4a7   : > { %2696 = sbr.rel (%p2893_p1) target bundleno = 1208 (0x4b8), region = 319  ;;  %s3672_s17 = smov (!%p2893_p1), 0  }
 0x4a8   : > { %s3676_s24 = smov (!%p2893_p1), 0  }
 0x4ae LB: >> { %v2481_v27 = vld [vmem:[%s3670_s21] sm:$0xff]  ;;  %s2483_s15 = sadd.s32 1, %s3674_s17  ;;  %s2475_s24 = sadd.s32 1, %s3678_s24   ;;  %s3678_s24 = sphi %s3676_s24, %s2475_s24   ;;  %s3674_s17 = sphi %s3672_s17, %s3673_s17   ;;  %s3670_s21 = sphi %s3668_s21, %s2488_s21   ;;  %s3666_s9 = sphi %s3664_s9, %s2489_s9  }
 0x4af   : >> { %2482 = vst [vmem:[%s3666_s9] sm:$0xff] %v2481_v27  ;;  %p2484_p2 = scmp.ge.s32.totalorder %s2483_s15, %s5291_s16  ;;  %p2474_p3 = scmp.ge.s32.totalorder %s2475_s24, %s5291_s16 }
 0x4b1   : >> { %s5530_s15 = smov (%p2484_p2, %s2483_s15), 0  ;;  %2477 = sbr.rel (!%p2474_p3) target bundleno = 1198 (0x4ae), region = 325 }
 0x4b2   : >> { %s2894_s27 = sshll.u32 %s5530_s15, 3  ;;  %s3673_s17 = smov %s5530_s15  }
 0x4b3   : >> { %s2488_s21 = scalar_lea.vmem %s2469_s23, %s2894_s27 [#allocation4]   ;;  %s2489_s9 = scalar_lea.vmem %s2471_s19, %s2894_s27  }
 0x4b8 PF: > { %p14_p5 = scmp.ge.s32.totalorder %s3729_s25, 4   ;;  %s5510_s21 = smov %s3578_s22 }
 0x4b9   : > { %s5511_s22 = smov %s3736_s28  ;;  %s5512_s23 = smov %s3729_s25 }
 0x4ba   :  { %16 = sbr.rel (!%p14_p5) target bundleno = 2 (0x2), region = 336 }

</bundles_post_ra>
